<compile_context>
chip_gen: v7x
topology: tpu7x:2x2x1
jax: 0.10.0
libtpu: 0.0.40
codegen_flags: <defaults>
</compile_context>

<pallas_src>
import jax
import jax.numpy as jnp
from jax import lax
from jax.experimental import pallas as pl
from jax.experimental.pallas import tpu as pltpu
import numpy as np

EPS = 1e-5


# ----------------------------------------------------------------------------
# Kernel 1: reparametrized 3x3 conv (center tap already holds +I and +adapter)
#           + per-image BatchNorm partial statistics.  One grid step per image.
# ----------------------------------------------------------------------------
def conv_stats_kernel(x_ref, w_ref, b_ref, y_ref, stats_ref, xpad_ref):
    # x_ref:     (H, W, Cin)
    # w_ref:     (9*Cin, Cout)    im2col-flattened 3x3 weights (tap-major, ci-minor)
    # b_ref:     (1, Cout)        fused bias (b1 + ba)
    # y_ref:     (H*W, Cout)      pre-BN conv output for this image
    # stats_ref: (2, Cout)        [sum, sum of squares] over H*W for this image
    # xpad_ref:  (H+2, W+2, Cin)  VMEM halo scratch
    H, W, Cin = x_ref.shape
    HW = H * W

    # Zero halo + copy the image into the interior (no padded HBM copy needed).
    # Re-zeroed every step so the batch grid axis can stay "parallel" across cores.
    xpad_ref[...] = jnp.zeros_like(xpad_ref)
    xpad_ref[1:H + 1, 1:W + 1, :] = x_ref[...]

    # im2col: one contraction-dense MXU matmul (K = 9*Cin) instead of nine K=Cin ones.
    taps = [
        xpad_ref[dy:dy + H, dx:dx + W, :].reshape(HW, Cin)
        for dy in range(3) for dx in range(3)
    ]
    patches = jnp.concatenate(taps, axis=-1)                        # (HW, 9*Cin)
    acc = jnp.dot(patches, w_ref[...],
                  preferred_element_type=jnp.float32) + b_ref[...]   # (HW, Cout)

    # Per-image BN partial stats; the tiny cross-batch reduction happens in JAX.
    stats_ref[0:1, :] = jnp.sum(acc, axis=0, keepdims=True)
    stats_ref[1:2, :] = jnp.sum(acc * acc, axis=0, keepdims=True)

    y_ref[...] = acc.astype(y_ref.dtype)


# ----------------------------------------------------------------------------
# Kernel 2: lane-dense streaming BatchNorm(affine, batch stats) + ReLU.
# Operates on (tr, W*Cout) tiles so the last (lane) dim is a multiple of 128.
# ----------------------------------------------------------------------------
def bn_relu_kernel(y_ref, scale_ref, shift_ref, o_ref):
    o_ref[...] = jnp.maximum(y_ref[...] * scale_ref[...] + shift_ref[...], 0.0)


# ----------------------------------------------------------------------------
# Wrapper
# ----------------------------------------------------------------------------
def unet_block_forward(x_nhwc, w1, b1, wa, ba, gamma, beta):
    """x_nhwc: (N,H,W,Cin); w1: (3,3,Cin,Cout); wa: (Cin,Cout); 1-D params: (Cout,)."""
    N, H, W, Cin = x_nhwc.shape
    Cout = w1.shape[-1]
    assert Cin == Cout, "residual path in this block requires in_channels == out_channels"

    x_nhwc = x_nhwc.astype(jnp.float32)

    # Fold identity + 1x1 adapter into the 3x3 center tap (reparametrize_convs algebra).
    w_fused = w1.astype(jnp.float32).at[1, 1].add(
        wa.astype(jnp.float32) + jnp.eye(Cin, dtype=jnp.float32))
    w_flat = w_fused.reshape(9 * Cin, Cout)                 # tap-major, ci-minor
    b_fused = (b1 + ba).reshape(1, Cout).astype(jnp.float32)

    y_pre, stats = pl.pallas_call(
        conv_stats_kernel,
        out_shape=(
            jax.ShapeDtypeStruct((N, H * W, Cout), jnp.float32),
            jax.ShapeDtypeStruct((N, 2, Cout), jnp.float32),
        ),
        grid_spec=pltpu.PrefetchScalarGridSpec(
            num_scalar_prefetch=0,
            grid=(N,),
            in_specs=[
                pl.BlockSpec((None, H, W, Cin), lambda i: (i, 0, 0, 0)),
                pl.BlockSpec((9 * Cin, Cout), lambda i: (0, 0)),
                pl.BlockSpec((1, Cout), lambda i: (0, 0)),
            ],
            out_specs=(
                pl.BlockSpec((None, H * W, Cout), lambda i: (i, 0, 0)),
                pl.BlockSpec((None, 2, Cout), lambda i: (i, 0, 0)),
            ),
            scratch_shapes=[pltpu.VMEM((H + 2, W + 2, Cin), jnp.float32)],
        ),
        compiler_params=pltpu.CompilerParams(
            dimension_semantics=("parallel",),
            vmem_limit_bytes=32 * 1024 * 1024,
        ),
    )(x_nhwc, w_flat, b_fused)

    # Tiny cross-batch reduction of the BN statistics (2*Cout numbers per image).
    cnt = jnp.float32(N * H * W)
    mean = jnp.sum(stats[:, 0, :], axis=0) / cnt
    var = jnp.maximum(jnp.sum(stats[:, 1, :], axis=0) / cnt - mean * mean, 0.0)
    scale = gamma.astype(jnp.float32) * lax.rsqrt(var + EPS)
    shift = beta.astype(jnp.float32) - mean * scale
    # Per-lane scale/shift for the lane-dense (rows, W*Cout) layout (w-major, c-minor).
    scale_l = jnp.tile(scale, W).reshape(1, W * Cout)
    shift_l = jnp.tile(shift, W).reshape(1, W * Cout)

    # Free HBM layout change: (N, H*W, Cout) -> (N*H, W*Cout); lane dim = W*Cout (=128).
    rows = N * H
    y2d = y_pre.reshape(rows, W * Cout)

    # Row-tile size: multiple of H (so it divides rows), capped at ~1 MiB per block.
    tr = H
    while rows % (tr * 2) == 0 and (tr * 2) * W * Cout * 4 <= (1 << 20):
        tr *= 2
    if tr != rows and tr % 8 != 0:
        tr = rows   # single block if tiling would violate the (8,128) block rule

    out2d = pl.pallas_call(
        bn_relu_kernel,
        out_shape=jax.ShapeDtypeStruct((rows, W * Cout), jnp.float32),
        grid=(rows // tr,),
        in_specs=[
            pl.BlockSpec((tr, W * Cout), lambda r: (r, 0)),
            pl.BlockSpec((1, W * Cout), lambda r: (0, 0)),
            pl.BlockSpec((1, W * Cout), lambda r: (0, 0)),
        ],
        out_specs=pl.BlockSpec((tr, W * Cout), lambda r: (r, 0)),
        compiler_params=pltpu.CompilerParams(
            dimension_semantics=("parallel",),
            vmem_limit_bytes=32 * 1024 * 1024,
        ),
    )(y2d, scale_l, shift_l)

    return out2d.reshape(N, H, W, Cout)


# ----------------------------------------------------------------------------
# Pure-JAX reference (for correctness check; uses the un-fused parameters)
# ----------------------------------------------------------------------------
def reference_forward(x_nhwc, w1, b1, wa, ba, gamma, beta):
    y = lax.conv_general_dilated(
        x_nhwc, w1, window_strides=(1, 1), padding="SAME",
        dimension_numbers=("NHWC", "HWIO", "NHWC")) + b1
    adapter = jnp.einsum("nhwc,cd->nhwd", x_nhwc, wa) + ba
    y = y + x_nhwc + adapter
    mean = jnp.mean(y, axis=(0, 1, 2))
    var = jnp.mean((y - mean) ** 2, axis=(0, 1, 2))
    y = (y - mean) * lax.rsqrt(var + EPS) * gamma + beta
    return jnp.maximum(y, 0.0)


if __name__ == "__main__":
    N, H, W = 2, 16, 16
    Cin = Cout = 8   # in_channels == out_channels -> residual path is active

    key = jax.random.PRNGKey(0)
    k_x, k_w1, k_b1, k_wa, k_ba, k_g, k_b = jax.random.split(key, 7)

    x = jax.random.normal(k_x, (N, H, W, Cin), dtype=jnp.float32)
    fan1 = Cin * 3 * 3
    w1 = jax.random.uniform(k_w1, (3, 3, Cin, Cout), jnp.float32,
                            -1.0 / np.sqrt(fan1), 1.0 / np.sqrt(fan1))
    b1 = jax.random.uniform(k_b1, (Cout,), jnp.float32,
                            -1.0 / np.sqrt(fan1), 1.0 / np.sqrt(fan1))
    fana = Cin
    wa = jax.random.uniform(k_wa, (Cin, Cout), jnp.float32,
                            -1.0 / np.sqrt(fana), 1.0 / np.sqrt(fana))
    ba = jax.random.uniform(k_ba, (Cout,), jnp.float32,
                            -1.0 / np.sqrt(fana), 1.0 / np.sqrt(fana))
    gamma = 1.0 + 0.1 * jax.random.normal(k_g, (Cout,), jnp.float32)
    beta = 0.1 * jax.random.normal(k_b, (Cout,), jnp.float32)

    out = jax.block_until_ready(unet_block_forward(x, w1, b1, wa, ba, gamma, beta))

    ref = reference_forward(x, w1, b1, wa, ba, gamma, beta)
    np.testing.assert_allclose(np.asarray(out), np.asarray(ref), rtol=1e-4, atol=1e-4)

    print("KERNEL_OK")
</pallas_src>

<mosaic_0001>
module attributes {stable_mosaic.version = 11 : i64} {
  func.func @conv_stats_kernel(%arg0: i32, %arg1: memref<1x16x16x8xf32, #tpu.memory_space<vmem>>, %arg2: memref<72x8xf32, #tpu.memory_space<vmem>>, %arg3: memref<1x8xf32, #tpu.memory_space<vmem>>, %arg4: memref<1x256x8xf32, #tpu.memory_space<vmem>>, %arg5: memref<1x2x8xf32, #tpu.memory_space<vmem>>, %arg6: memref<18x18x8xf32, #tpu.memory_space<vmem>>) attributes {dimension_semantics = [#tpu.dimension_semantics<parallel>], iteration_bounds = array<i64: 2>, scalar_prefetch = 0 : i64, scratch_operands = 1 : i64, tpu.core_type = #tpu.core_type<tc>, window_params = [{transform_indices = @transform_0, window_bounds = array<i64: 1, 16, 16, 8>}, {pipeline_mode = #tpu.pipeline_mode<synchronous>, transform_indices = @transform_1, window_bounds = array<i64: 72, 8>}, {pipeline_mode = #tpu.pipeline_mode<synchronous>, transform_indices = @transform_2, window_bounds = array<i64: 1, 8>}, {transform_indices = @transform_3, window_bounds = array<i64: 1, 256, 8>}, {transform_indices = @transform_4, window_bounds = array<i64: 1, 2, 8>}]} {
    %cst = arith.constant 0.000000e+00 : f32
    %0 = vector.broadcast %cst : f32 to vector<18x18x8xf32>
    %c0 = arith.constant 0 : index
    %c0_0 = arith.constant 0 : index
    %c0_1 = arith.constant 0 : index
    %1 = vector.load %arg6[%c0, %c0_0, %c0_1] : memref<18x18x8xf32, #tpu.memory_space<vmem>>, vector<18x18x8xf32>
    tpu.vector_store %arg6[%c0, %c0_0, %c0_1], %0 {strides = array<i32>} : memref<18x18x8xf32, #tpu.memory_space<vmem>>, vector<18x18x8xf32>,
    %c0_2 = arith.constant 0 : index
    %c0_3 = arith.constant 0 : index
    %c0_4 = arith.constant 0 : index
    %c0_5 = arith.constant 0 : index
    %2 = vector.load %arg1[%c0_2, %c0_3, %c0_4, %c0_5] : memref<1x16x16x8xf32, #tpu.memory_space<vmem>>, vector<1x16x16x8xf32>
    %3 = vector.shape_cast %2 : vector<1x16x16x8xf32> to vector<16x16x8xf32>
    %c1 = arith.constant 1 : index
    %c1_6 = arith.constant 1 : index
    %c0_7 = arith.constant 0 : index
    %4 = vector.load %arg6[%c1, %c1_6, %c0_7] : memref<18x18x8xf32, #tpu.memory_space<vmem>>, vector<16x16x8xf32>
    tpu.vector_store %arg6[%c1, %c1_6, %c0_7], %3 {strides = array<i32>} : memref<18x18x8xf32, #tpu.memory_space<vmem>>, vector<16x16x8xf32>,
    %c0_8 = arith.constant 0 : index
    %c0_9 = arith.constant 0 : index
    %c0_10 = arith.constant 0 : index
    %5 = vector.load %arg6[%c0_8, %c0_9, %c0_10] : memref<18x18x8xf32, #tpu.memory_space<vmem>>, vector<16x16x8xf32>
    %6 = vector.shape_cast %5 : vector<16x16x8xf32> to vector<256x8xf32>
    %c0_11 = arith.constant 0 : index
    %c1_12 = arith.constant 1 : index
    %c0_13 = arith.constant 0 : index
    %7 = vector.load %arg6[%c0_11, %c1_12, %c0_13] : memref<18x18x8xf32, #tpu.memory_space<vmem>>, vector<16x16x8xf32>
    %8 = vector.shape_cast %7 : vector<16x16x8xf32> to vector<256x8xf32>
    %c0_14 = arith.constant 0 : index
    %c2 = arith.constant 2 : index
    %c0_15 = arith.constant 0 : index
    %9 = vector.load %arg6[%c0_14, %c2, %c0_15] : memref<18x18x8xf32, #tpu.memory_space<vmem>>, vector<16x16x8xf32>
    %10 = vector.shape_cast %9 : vector<16x16x8xf32> to vector<256x8xf32>
    %c1_16 = arith.constant 1 : index
    %c0_17 = arith.constant 0 : index
    %c0_18 = arith.constant 0 : index
    %11 = vector.load %arg6[%c1_16, %c0_17, %c0_18] : memref<18x18x8xf32, #tpu.memory_space<vmem>>, vector<16x16x8xf32>
    %12 = vector.shape_cast %11 : vector<16x16x8xf32> to vector<256x8xf32>
    %c1_19 = arith.constant 1 : index
    %c1_20 = arith.constant 1 : index
    %c0_21 = arith.constant 0 : index
    %13 = vector.load %arg6[%c1_19, %c1_20, %c0_21] : memref<18x18x8xf32, #tpu.memory_space<vmem>>, vector<16x16x8xf32>
    %14 = vector.shape_cast %13 : vector<16x16x8xf32> to vector<256x8xf32>
    %c1_22 = arith.constant 1 : index
    %c2_23 = arith.constant 2 : index
    %c0_24 = arith.constant 0 : index
    %15 = vector.load %arg6[%c1_22, %c2_23, %c0_24] : memref<18x18x8xf32, #tpu.memory_space<vmem>>, vector<16x16x8xf32>
    %16 = vector.shape_cast %15 : vector<16x16x8xf32> to vector<256x8xf32>
    %c2_25 = arith.constant 2 : index
    %c0_26 = arith.constant 0 : index
    %c0_27 = arith.constant 0 : index
    %17 = vector.load %arg6[%c2_25, %c0_26, %c0_27] : memref<18x18x8xf32, #tpu.memory_space<vmem>>, vector<16x16x8xf32>
    %18 = vector.shape_cast %17 : vector<16x16x8xf32> to vector<256x8xf32>
    %c2_28 = arith.constant 2 : index
    %c1_29 = arith.constant 1 : index
    %c0_30 = arith.constant 0 : index
    %19 = vector.load %arg6[%c2_28, %c1_29, %c0_30] : memref<18x18x8xf32, #tpu.memory_space<vmem>>, vector<16x16x8xf32>
    %20 = vector.shape_cast %19 : vector<16x16x8xf32> to vector<256x8xf32>
    %c2_31 = arith.constant 2 : index
    %c2_32 = arith.constant 2 : index
    %c0_33 = arith.constant 0 : index
    %21 = vector.load %arg6[%c2_31, %c2_32, %c0_33] : memref<18x18x8xf32, #tpu.memory_space<vmem>>, vector<16x16x8xf32>
    %22 = vector.shape_cast %21 : vector<16x16x8xf32> to vector<256x8xf32>
    %23 = tpu.concatenate %6, %8, %10, %12, %14, %16, %18, %20, %22 in 1 : vector<256x8xf32>, vector<256x8xf32>, vector<256x8xf32>, vector<256x8xf32>, vector<256x8xf32>, vector<256x8xf32>, vector<256x8xf32>, vector<256x8xf32>, vector<256x8xf32> -> vector<256x72xf32>
    %c0_34 = arith.constant 0 : index
    %c0_35 = arith.constant 0 : index
    %24 = vector.load %arg2[%c0_34, %c0_35] : memref<72x8xf32, #tpu.memory_space<vmem>>, vector<72x8xf32>
    %cst_36 = arith.constant dense<0.000000e+00> : vector<256x8xf32>
    %25 = tpu.matmul %23, %24, %cst_36 {dimension_numbers = #tpu.dot_dimension_numbers<[1], [0], [0], [1], [0, 0, 1, 1], [], []>} : vector<256x72xf32>, vector<72x8xf32>, vector<256x8xf32> -> vector<256x8xf32>
    %c0_37 = arith.constant 0 : index
    %c0_38 = arith.constant 0 : index
    %26 = vector.load %arg3[%c0_37, %c0_38] : memref<1x8xf32, #tpu.memory_space<vmem>>, vector<1x8xf32>
    %27 = vector.broadcast %26 : vector<1x8xf32> to vector<256x8xf32>
    %28 = arith.addf %25, %27 : vector<256x8xf32>
    %cst_39 = arith.constant dense<0.000000e+00> : vector<8xf32>
    %29 = vector.multi_reduction <add>, %28, %cst_39 [0] : vector<256x8xf32> to vector<8xf32>
    %30 = vector.shape_cast %29 : vector<8xf32> to vector<1x8xf32>
    %c0_40 = arith.constant 0 : index
    %c0_41 = arith.constant 0 : index
    %c0_42 = arith.constant 0 : index
    %31 = vector.load %arg5[%c0_40, %c0_41, %c0_42] : memref<1x2x8xf32, #tpu.memory_space<vmem>>, vector<1x1x8xf32>
    %32 = vector.shape_cast %31 : vector<1x1x8xf32> to vector<1x8xf32>
    %33 = vector.shape_cast %30 : vector<1x8xf32> to vector<1x1x8xf32>
    tpu.vector_store %arg5[%c0_40, %c0_41, %c0_42], %33 {strides = array<i32>} : memref<1x2x8xf32, #tpu.memory_space<vmem>>, vector<1x1x8xf32>,
    %34 = arith.mulf %28, %28 : vector<256x8xf32>
    %cst_43 = arith.constant dense<0.000000e+00> : vector<8xf32>
    %35 = vector.multi_reduction <add>, %34, %cst_43 [0] : vector<256x8xf32> to vector<8xf32>
    %36 = vector.shape_cast %35 : vector<8xf32> to vector<1x8xf32>
    %c0_44 = arith.constant 0 : index
    %c1_45 = arith.constant 1 : index
    %c0_46 = arith.constant 0 : index
    %37 = vector.load %arg5[%c0_44, %c1_45, %c0_46] : memref<1x2x8xf32, #tpu.memory_space<vmem>>, vector<1x1x8xf32>
    %38 = vector.shape_cast %37 : vector<1x1x8xf32> to vector<1x8xf32>
    %39 = vector.shape_cast %36 : vector<1x8xf32> to vector<1x1x8xf32>
    tpu.vector_store %arg5[%c0_44, %c1_45, %c0_46], %39 {strides = array<i32>} : memref<1x2x8xf32, #tpu.memory_space<vmem>>, vector<1x1x8xf32>,
    %c0_47 = arith.constant 0 : index
    %c0_48 = arith.constant 0 : index
    %c0_49 = arith.constant 0 : index
    %40 = vector.load %arg4[%c0_47, %c0_48, %c0_49] : memref<1x256x8xf32, #tpu.memory_space<vmem>>, vector<1x256x8xf32>
    %41 = vector.shape_cast %40 : vector<1x256x8xf32> to vector<256x8xf32>
    %42 = vector.shape_cast %28 : vector<256x8xf32> to vector<1x256x8xf32>
    tpu.vector_store %arg4[%c0_47, %c0_48, %c0_49], %42 {strides = array<i32>} : memref<1x256x8xf32, #tpu.memory_space<vmem>>, vector<1x256x8xf32>,
    return
  }
  func.func @transform_0(%arg0: i32) -> (i32, i32, i32, i32) {
    %c0_i32 = arith.constant 0 : i32
    %c0_i32_0 = arith.constant 0 : i32
    %c0_i32_1 = arith.constant 0 : i32
    %c0_i32_2 = arith.constant 0 : i32
    return %arg0, %c0_i32, %c0_i32_0, %c0_i32_1 : i32, i32, i32, i32
  }
  func.func @transform_1(%arg0: i32) -> (i32, i32) {
    %c0_i32 = arith.constant 0 : i32
    %c0_i32_0 = arith.constant 0 : i32
    %c0_i32_1 = arith.constant 0 : i32
    return %c0_i32, %c0_i32_0 : i32, i32
  }
  func.func @transform_2(%arg0: i32) -> (i32, i32) {
    %c0_i32 = arith.constant 0 : i32
    %c0_i32_0 = arith.constant 0 : i32
    %c0_i32_1 = arith.constant 0 : i32
    return %c0_i32, %c0_i32_0 : i32, i32
  }
  func.func @transform_3(%arg0: i32) -> (i32, i32, i32) {
    %c0_i32 = arith.constant 0 : i32
    %c0_i32_0 = arith.constant 0 : i32
    %c0_i32_1 = arith.constant 0 : i32
    return %arg0, %c0_i32, %c0_i32_0 : i32, i32, i32
  }
  func.func @transform_4(%arg0: i32) -> (i32, i32, i32) {
    %c0_i32 = arith.constant 0 : i32
    %c0_i32_0 = arith.constant 0 : i32
    %c0_i32_1 = arith.constant 0 : i32
    return %arg0, %c0_i32, %c0_i32_0 : i32, i32, i32
  }
}

</mosaic_0001>

<bundles_post_ra>
// kernel: tpu_custom_call.1
= control target key start
LH: loop header
LB: loop body
LE: loop exit
PB: predicated region body
PF: predicated region fallthrough
CT: control target
= control target key end

     0   :  { %10 = vsyncpa [#allocation4], 0  ;;  %s4380_s0 = inlined_call_operand.vmem [shape: f32[2,16,16,8], index: 0, kind: input, shape index: {}]   ;;  %s4381_s1 = inlined_call_operand.vmem [shape: f32[72,8], index: 1, kind: input, shape index: {}]   ;;  %s4382_s2 = inlined_call_operand.vmem [shape: f32[1,8], index: 2, kind: input, shape index: {}]   ;;  %s4383_s3 = inlined_call_operand.vmem [shape: f32[2,256,8], index: 3, kind: output, shape index: {0}]   ;;  %s4384_s4 = inlined_call_operand.hbm [shape: f32[2,2,8], index: 4, kind: output, shape index: {1}]  }
   0x1   :  { %12 = vsyncpa [#allocation4 + $0x1], 0  ;;  %s2883_s15 = smov 0   ;;  %s2885_s16 = smov 0  }
   0x2   :  { %s2887_s17 = smov 0   ;;  %s2889_s18 = smov 0  }
   0x3 LB: > { %s2904_s19 = sadd.s32 4294967295, %s2846_s18   ;;  %s2555_s20 = sadd.s32 4294967294, %s2846_s18   ;;  %s2846_s18 = sphi %s2889_s18, %s4486_s18   ;;  %s2842_s17 = sphi %s2887_s17, %s4485_s17   ;;  %s2838_s16 = sphi %s2885_s16, %s4484_s16   ;;  %s2834_s15 = sphi %s2883_s15, %s4483_s15  }
   0x4   : > { %s2908_s21 = sadd.s32 1, %s2846_s18   ;;  %s119_s22 = sadd.s32 1, %s2842_s17 }
   0x5   : > { %s116_s23 = ssub.s32 %s2846_s18, %s2908_s21  ;;  %p129_p0 = scmp.ne.s32.totalorder %s2842_s17, %s2838_s16 }
   0x6   : > { %p117_p1 = scmp.eq.s32.totalorder %s116_s23, 0  ;;  %p130_p2 = scmp.eq.s32.totalorder %s2904_s19, 1 }
   0x7   : > { %p135_p3 = scmp.ne.s32.totalorder %s2838_s16, %s2834_s15  ;;  %p136_p4 = scmp.eq.s32.totalorder %s2555_s20, 1 }
   0x8   : > { %s2919_s24 = scalar_select %p117_p1, %s2842_s17, %s119_s22  }
   0x9   : > { %p2921_p5 = por %p130_p2, %p129_p0  ;;  %p2925_p6 = por %p136_p4, %p135_p3 }
   0xa   : > { %p2558_p7 = scmp.ge.s32.totalorder %s2846_s18, 1  ;;  %p168_p8 = scmp.lt.s32.totalorder %s2846_s18, 3 }
   0xc   : > { %p169_p9 = pnand %p2558_p7, %p168_p8 }
   0xe   : > { %172 = sbr.rel (%p169_p9) target bundleno = 929 (0x3a1), region = 32 }
  0x15   : > { %vm209_vm0 = vcmask 64512   ;;  %vm212_vm1 = vcmask 58368   ;;  %p199_p10 = scmp.lt.s32.totalorder %s2904_s19, 1  ;;  %v2848_v0 = vmov 0.0   ;;  %s2849_s6 = smov 8   ;;  %vm1675_vm2 = vcmask 130048  }
  0x16   : > { %210 = vst.msk [vmem:[#allocation2] sm:$0xff] %vm209_vm0, %v2848_v0  ;;  %211 = vst.msk [vmem:[#allocation2 + $0x8] sm:$0xff] %vm209_vm0, %v2848_v0  ;;  %s2850_s7 = smov 16   ;;  %s2851_s8 = smov 24   ;;  %vm1708_vm3 = vcmask 195584   ;;  %vm1741_vm4 = vcmask 261120  }
  0x17   : > { %214 = vst.msk [vmem:[#allocation2 + $0x18] sm:$0xff] %vm209_vm0, %v2848_v0  ;;  %215 = vst.msk [vmem:[#allocation2 + $0x20] sm:$0xff] %vm209_vm0, %v2848_v0  ;;  %s2989_s27 = scalar_select %p199_p10, %s2904_s19, 1  ;;  %vm1774_vm5 = vcmask 326656   ;;  %vm1840_vm6 = vcmask 457728   ;;  %vm1807_vm7 = vcmask 392192  }
  0x18   : > { %217 = vst.msk [vmem:[#allocation2 + $0x30] sm:$0xff] %vm209_vm0, %v2848_v0  ;;  %218 = vst.msk [vmem:[#allocation2 + $0x38] sm:$0xff] %vm209_vm0, %v2848_v0  ;;  %s2852_s23 = smov 32   ;;  %s2853_s9 = smov 40   ;;  %vm1873_vm8 = vcmask 523264   ;;  %vm1922_vm9 = vcmask 588800  }
  0x19   : > { %220 = vst.msk [vmem:[#allocation2 + $0x48] sm:$0xff] %vm209_vm0, %v2848_v0  ;;  %221 = vst.msk [vmem:[#allocation2 + $0x50] sm:$0xff] %vm209_vm0, %v2848_v0  ;;  %s2601_s28 = sshll.u32 %s2989_s27, 8  ;;  %s2854_s14 = smov 48   ;;  %vm2313_vm10 = vcmask 57344  }
  0x1a   : > { %223 = vst.msk [vmem:[#allocation2 + $0x60] sm:$0xff] %vm209_vm0, %v2848_v0  ;;  %224 = vst.msk [vmem:[#allocation2 + $0x68] sm:$0xff] %vm209_vm0, %v2848_v0  ;;  %s2997_s5 = scalar_lea.vmem %s4380_s0, %s2601_s28  ;;  %s2855_s29 = smov 56  }
  0x1b   : > { %226 = vst.msk [vmem:[#allocation2 + $0x78] sm:$0xff] %vm209_vm0, %v2848_v0  ;;  %227 = vst.msk [vmem:[#allocation2 + $0x80] sm:$0xff] %vm209_vm0, %v2848_v0  ;;  %v265_v1 = vld [vmem:[%s2997_s5] sm:$0xff]  ;;  %v267_v2 = vld [vmem:[%s2997_s5 + $0x10] sm:$0xff]  ;;  %s2856_s30 = smov 64   ;;  %s196_s27 = sand.u32 1, %s2838_s16  }
  0x1c   : > { %229 = vst.msk [vmem:[#allocation2 + $0x90] sm:$0xff] %vm209_vm0, %v2848_v0  ;;  %230 = vst.msk [vmem:[#allocation2 + $0x98] sm:$0xff] %vm209_vm0, %v2848_v0  ;;  %v266_v3 = vld [vmem:[%s2997_s5 + $0x8] sm:$0xff]  ;;  %v269_v4 = vld [vmem:[%s2997_s5 + $0x20] sm:$0xff]  ;;  %s2455_s20 = scalar_lea.sflag [#allocation4], %s196_s27 }
  0x1d   : > { %232 = vst.msk [vmem:[#allocation2 + $0xa8] sm:$0xff] %vm209_vm0, %v2848_v0  ;;  %233 = vst.msk [vmem:[#allocation2 + $0xb0] sm:$0xff] %vm209_vm0, %v2848_v0  ;;  %v268_v5 = vld [vmem:[%s2997_s5 + $0x18] sm:$0xff]  ;;  %v271_v6 = vld [vmem:[%s2997_s5 + $0x30] sm:$0xff] }
  0x1e   : > { %235 = vst.msk [vmem:[#allocation2 + $0xc0] sm:$0xff] %vm209_vm0, %v2848_v0  ;;  %236 = vst.msk [vmem:[#allocation2 + $0xc8] sm:$0xff] %vm209_vm0, %v2848_v0  ;;  %v362_v7 = vld [vmem:[#allocation2 + $0x1] sm:$0xff]  ;;  %v272_v11 = vld [vmem:[%s2997_s5 + $0x38] sm:$0xff] }
  0x1f   : > { %238 = vst.msk [vmem:[#allocation2 + $0xd8] sm:$0xff] %vm209_vm0, %v2848_v0  ;;  %239 = vst.msk [vmem:[#allocation2 + $0xe0] sm:$0xff] %vm209_vm0, %v2848_v0  ;;  %v270_v9 = vld [vmem:[%s2997_s5 + $0x28] sm:$0xff]  ;;  %651 = vrot.lane.b32.xlu0 %v362_v7, %s2849_s6  ;;  %v273_v10 = vld [vmem:[%s2997_s5 + $0x40] sm:$0xff] }
  0x20   : > { %241 = vst.msk [vmem:[#allocation2 + $0xf0] sm:$0xff] %vm209_vm0, %v2848_v0  ;;  %242 = vst.msk [vmem:[#allocation2 + $0xf8] sm:$0xff] %vm209_vm0, %v2848_v0  ;;  %v275_v12 = vld [vmem:[%s2997_s5 + $0x50] sm:$0xff]  ;;  %v274_v13 = vld [vmem:[%s2997_s5 + $0x48] sm:$0xff] }
  0x21   : > { %244 = vst.msk [vmem:[#allocation2 + $0x108] sm:$0xff] %vm209_vm0, %v2848_v0  ;;  %245 = vst.msk [vmem:[#allocation2 + $0x110] sm:$0xff] %vm209_vm0, %v2848_v0  ;;  %v277_v14 = vld [vmem:[%s2997_s5 + $0x60] sm:$0xff]  ;;  %v276_v15 = vld [vmem:[%s2997_s5 + $0x58] sm:$0xff] }
  0x22   : > { %247 = vst.msk [vmem:[#allocation2 + $0x120] sm:$0xff] %vm209_vm0, %v2848_v0  ;;  %248 = vst.msk [vmem:[#allocation2 + $0x128] sm:$0xff] %vm209_vm0, %v2848_v0  ;;  %v279_v16 = vld [vmem:[%s2997_s5 + $0x70] sm:$0xff]  ;;  %v278_v17 = vld [vmem:[%s2997_s5 + $0x68] sm:$0xff] }
  0x23   : > { %250 = vst.msk [vmem:[#allocation2 + $0x138] sm:$0xff] %vm209_vm0, %v2848_v0  ;;  %251 = vst.msk [vmem:[#allocation2 + $0x140] sm:$0xff] %vm209_vm0, %v2848_v0  ;;  %v281_v18 = vld [vmem:[%s2997_s5 + $0x80] sm:$0xff]  ;;  %v280_v19 = vld [vmem:[%s2997_s5 + $0x78] sm:$0xff] }
  0x24   : > { %253 = vst.msk [vmem:[#allocation2 + $0x150] sm:$0xff] %vm209_vm0, %v2848_v0  ;;  %254 = vst.msk [vmem:[#allocation2 + $0x158] sm:$0xff] %vm209_vm0, %v2848_v0  ;;  %v283_v20 = vld [vmem:[%s2997_s5 + $0x90] sm:$0xff]  ;;  %v282_v21 = vld [vmem:[%s2997_s5 + $0x88] sm:$0xff] }
  0x25   : > { %256 = vst.msk [vmem:[#allocation2 + $0x168] sm:$0xff] %vm209_vm0, %v2848_v0  ;;  %257 = vst.msk [vmem:[#allocation2 + $0x170] sm:$0xff] %vm209_vm0, %v2848_v0  ;;  %v285_v22 = vld [vmem:[%s2997_s5 + $0xa0] sm:$0xff]  ;;  %v284_v23 = vld [vmem:[%s2997_s5 + $0x98] sm:$0xff] }
  0x26   : > { %259 = vst.msk [vmem:[#allocation2 + $0x180] sm:$0xff] %vm209_vm0, %v2848_v0  ;;  %260 = vst.msk [vmem:[#allocation2 + $0x188] sm:$0xff] %vm209_vm0, %v2848_v0  ;;  %v287_v24 = vld [vmem:[%s2997_s5 + $0xb0] sm:$0xff]  ;;  %v286_v28 = vld [vmem:[%s2997_s5 + $0xa8] sm:$0xff] }
  0x27   : > { %262 = vst.msk [vmem:[#allocation2 + $0x198] sm:$0xff] %vm209_vm0, %v2848_v0  ;;  %263 = vst.msk [vmem:[#allocation2 + $0x1a0] sm:$0xff] %vm209_vm0, %v2848_v0  ;;  %v289_v29 = vld [vmem:[%s2997_s5 + $0xc0] sm:$0xff]  ;;  %v288_v33 = vld [vmem:[%s2997_s5 + $0xb8] sm:$0xff] }
  0x28   : > { %213 = vst.msk [vmem:[#allocation2 + $0x10] sm:$0x3] %vm212_vm1, %v2848_v0  ;;  %216 = vst.msk [vmem:[#allocation2 + $0x28] sm:$0x3] %vm212_vm1, %v2848_v0  ;;  %v291_v34 = vld [vmem:[%s2997_s5 + $0xd0] sm:$0xff]  ;;  %v290_v35 = vld [vmem:[%s2997_s5 + $0xc8] sm:$0xff] }
  0x29   : > { %219 = vst.msk [vmem:[#allocation2 + $0x40] sm:$0x3] %vm212_vm1, %v2848_v0  ;;  %222 = vst.msk [vmem:[#allocation2 + $0x58] sm:$0x3] %vm212_vm1, %v2848_v0  ;;  %v293_v36 = vld [vmem:[%s2997_s5 + $0xe0] sm:$0xff]  ;;  %v292_v37 = vld [vmem:[%s2997_s5 + $0xd8] sm:$0xff] }
  0x2a   : > { %225 = vst.msk [vmem:[#allocation2 + $0x70] sm:$0x3] %vm212_vm1, %v2848_v0  ;;  %228 = vst.msk [vmem:[#allocation2 + $0x88] sm:$0x3] %vm212_vm1, %v2848_v0  ;;  %v294_v39 = vld [vmem:[%s2997_s5 + $0xe8] sm:$0xff] }
  0x2b   : > { %231 = vst.msk [vmem:[#allocation2 + $0xa0] sm:$0x3] %vm212_vm1, %v2848_v0  ;;  %234 = vst.msk [vmem:[#allocation2 + $0xb8] sm:$0x3] %vm212_vm1, %v2848_v0  ;;  %v394_v62 = vld [vmem:[#allocation2 + $0x2] sm:$0xff] }
  0x2c   : > { %237 = vst.msk [vmem:[#allocation2 + $0xd0] sm:$0x3] %vm212_vm1, %v2848_v0  ;;  %240 = vst.msk [vmem:[#allocation2 + $0xe8] sm:$0x3] %vm212_vm1, %v2848_v0 }
  0x2d   : > { %243 = vst.msk [vmem:[#allocation2 + $0x100] sm:$0x3] %vm212_vm1, %v2848_v0  ;;  %246 = vst.msk [vmem:[#allocation2 + $0x118] sm:$0x3] %vm212_vm1, %v2848_v0 }
  0x2e   : > { %249 = vst.msk [vmem:[#allocation2 + $0x130] sm:$0x3] %vm212_vm1, %v2848_v0  ;;  %252 = vst.msk [vmem:[#allocation2 + $0x148] sm:$0x3] %vm212_vm1, %v2848_v0 }
  0x2f   : > { %255 = vst.msk [vmem:[#allocation2 + $0x160] sm:$0x3] %vm212_vm1, %v2848_v0  ;;  %258 = vst.msk [vmem:[#allocation2 + $0x178] sm:$0x3] %vm212_vm1, %v2848_v0  ;;  %v363_v8 = vld [vmem:[#allocation2 + $0x9] sm:$0xff] }
  0x30   : > { %261 = vst.msk [vmem:[#allocation2 + $0x190] sm:$0x3] %vm212_vm1, %v2848_v0  ;;  %264 = vst.msk [vmem:[#allocation2 + $0x1a8] sm:$0x3] %vm212_vm1, %v2848_v0  ;;  %653 = vrot.lane.b32.xlu0 %v363_v8, %s2849_s6 }
  0x31   : > { %298 = vst.msk [vmem:[#allocation2 + $0x19] sm:$0xff] %vm209_vm0, %v265_v1  ;;  %300 = vst.msk [vmem:[#allocation2 + $0x31] sm:$0xff] %vm209_vm0, %v267_v2  ;;  %v395_v1 = vld [vmem:[#allocation2 + $0xa] sm:$0xff] }
  0x32   : > { %299 = vst.msk [vmem:[#allocation2 + $0x21] sm:$0xff] %vm209_vm0, %v266_v3  ;;  %302 = vst.msk [vmem:[#allocation2 + $0x49] sm:$0xff] %vm209_vm0, %v269_v4 }
  0x33   : > { %301 = vst.msk [vmem:[#allocation2 + $0x39] sm:$0xff] %vm209_vm0, %v268_v5  ;;  %304 = vst.msk [vmem:[#allocation2 + $0x61] sm:$0xff] %vm209_vm0, %v271_v6 }
  0x34   : > { %303 = vst.msk [vmem:[#allocation2 + $0x51] sm:$0xff] %vm209_vm0, %v270_v9  ;;  %306 = vst.msk [vmem:[#allocation2 + $0x79] sm:$0xff] %vm209_vm0, %v273_v10 }
  0x35   : > { %305 = vst.msk [vmem:[#allocation2 + $0x69] sm:$0xff] %vm209_vm0, %v272_v11  ;;  %308 = vst.msk [vmem:[#allocation2 + $0x91] sm:$0xff] %vm209_vm0, %v275_v12 }
  0x36   : > { %307 = vst.msk [vmem:[#allocation2 + $0x81] sm:$0xff] %vm209_vm0, %v274_v13  ;;  %310 = vst.msk [vmem:[#allocation2 + $0xa9] sm:$0xff] %vm209_vm0, %v277_v14 }
  0x37   : > { %309 = vst.msk [vmem:[#allocation2 + $0x99] sm:$0xff] %vm209_vm0, %v276_v15  ;;  %312 = vst.msk [vmem:[#allocation2 + $0xc1] sm:$0xff] %vm209_vm0, %v279_v16 }
  0x38   : > { %311 = vst.msk [vmem:[#allocation2 + $0xb1] sm:$0xff] %vm209_vm0, %v278_v17  ;;  %314 = vst.msk [vmem:[#allocation2 + $0xd9] sm:$0xff] %vm209_vm0, %v281_v18  ;;  %v3042_v25 = vld [vmem:[#allocation2 + $0x19] sm:$0xff]  ;;  %v3044_v26 = vld [vmem:[#allocation2 + $0x31] sm:$0xff] }
  0x39   : > { %313 = vst.msk [vmem:[#allocation2 + $0xc9] sm:$0xff] %vm209_vm0, %v280_v19  ;;  %316 = vst.msk [vmem:[#allocation2 + $0xf1] sm:$0xff] %vm209_vm0, %v283_v20  ;;  %655 = vrot.lane.b32.xlu1 %v3042_v25, %s2849_s6  ;;  %v3051_v27 = vld [vmem:[#allocation2 + $0x21] sm:$0xff]  ;;  %659 = vrot.lane.b32.xlu0 %v3044_v26, %s2849_s6  ;;  %v3059_v30 = vld [vmem:[#allocation2 + $0x49] sm:$0xff] }
  0x3a   : > { %315 = vst.msk [vmem:[#allocation2 + $0xe1] sm:$0xff] %vm209_vm0, %v282_v21  ;;  %318 = vst.msk [vmem:[#allocation2 + $0x109] sm:$0xff] %vm209_vm0, %v285_v22  ;;  %v3063_v31 = vld [vmem:[#allocation2 + $0x39] sm:$0xff]  ;;  %v3067_v32 = vld [vmem:[#allocation2 + $0x61] sm:$0xff] }
  0x3b   : > { %317 = vst.msk [vmem:[#allocation2 + $0xf9] sm:$0xff] %vm209_vm0, %v284_v23  ;;  %320 = vst.msk [vmem:[#allocation2 + $0x121] sm:$0xff] %vm209_vm0, %v287_v24  ;;  %v3079_v38 = vld [vmem:[#allocation2 + $0x51] sm:$0xff]  ;;  %v3087_v40 = vld [vmem:[#allocation2 + $0x79] sm:$0xff] }
  0x3c   : > { %319 = vst.msk [vmem:[#allocation2 + $0x111] sm:$0xff] %vm209_vm0, %v286_v28  ;;  %322 = vst.msk [vmem:[#allocation2 + $0x139] sm:$0xff] %vm209_vm0, %v289_v29  ;;  %v3091_v41 = vld [vmem:[#allocation2 + $0x69] sm:$0xff]  ;;  %v3095_v42 = vld [vmem:[#allocation2 + $0x91] sm:$0xff] }
  0x3d   : > { %657 = vrot.lane.b32.xlu1 %v3051_v27, %s2849_s6  ;;  %663 = vrot.lane.b32.xlu0 %v3059_v30, %s2849_s6  ;;  %321 = vst.msk [vmem:[#allocation2 + $0x129] sm:$0xff] %vm209_vm0, %v288_v33  ;;  %324 = vst.msk [vmem:[#allocation2 + $0x151] sm:$0xff] %vm209_vm0, %v291_v34  ;;  %v3099_v43 = vld [vmem:[#allocation2 + $0x81] sm:$0xff]  ;;  %v3103_v44 = vld [vmem:[#allocation2 + $0xa9] sm:$0xff] }
  0x3e   : > { %323 = vst.msk [vmem:[#allocation2 + $0x141] sm:$0xff] %vm209_vm0, %v290_v35  ;;  %326 = vst.msk [vmem:[#allocation2 + $0x169] sm:$0xff] %vm209_vm0, %v293_v36  ;;  %v3107_v45 = vld [vmem:[#allocation2 + $0x99] sm:$0xff]  ;;  %v378_v46 = vld [vmem:[#allocation2 + $0xc1] sm:$0xff] }
  0x3f   : > { %325 = vst.msk [vmem:[#allocation2 + $0x159] sm:$0xff] %vm209_vm0, %v292_v37  ;;  %327 = vst.msk [vmem:[#allocation2 + $0x171] sm:$0xff] %vm209_vm0, %v294_v39  ;;  %v3113_v47 = vld [vmem:[#allocation2 + $0xb1] sm:$0xff]  ;;  %v380_v48 = vld [vmem:[#allocation2 + $0xd9] sm:$0xff] }
  0x40   : > { %v379_v49 = vld [vmem:[#allocation2 + $0xc9] sm:$0xff]  ;;  %v382_v50 = vld [vmem:[#allocation2 + $0xf1] sm:$0xff]  ;;  %v3133_v0 = vld [vmem:[#allocation2 + $0x1a] sm:$0xff] }
  0x41   : > { %661 = vrot.lane.b32.xlu1 %v3063_v31, %s2849_s6  ;;  %667 = vrot.lane.b32.xlu0 %v3067_v32, %s2849_s6  ;;  %v381_v51 = vld [vmem:[#allocation2 + $0xe1] sm:$0xff]  ;;  %v384_v52 = vld [vmem:[#allocation2 + $0x109] sm:$0xff]  ;;  %v3138_v2 = vld [vmem:[#allocation2 + $0x32] sm:$0xff] }
  0x42   : > { %v383_v53 = vld [vmem:[#allocation2 + $0xf9] sm:$0xff]  ;;  %v386_v54 = vld [vmem:[#allocation2 + $0x121] sm:$0xff]  ;;  %v3145_v4 = vld [vmem:[#allocation2 + $0x4a] sm:$0xff] }
  0x43   : > { %v385_v55 = vld [vmem:[#allocation2 + $0x111] sm:$0xff]  ;;  %v388_v56 = vld [vmem:[#allocation2 + $0x139] sm:$0xff]  ;;  %v3141_v3 = vld [vmem:[#allocation2 + $0x22] sm:$0xff] }
  0x44   : > { %v387_v57 = vld [vmem:[#allocation2 + $0x129] sm:$0xff]  ;;  %v390_v58 = vld [vmem:[#allocation2 + $0x151] sm:$0xff]  ;;  %v3149_v5 = vld [vmem:[#allocation2 + $0x3a] sm:$0xff] }
  0x45   : > { %665 = vrot.lane.b32.xlu1 %v3079_v38, %s2849_s6  ;;  %671 = vrot.lane.b32.xlu0 %v3087_v40, %s2849_s6  ;;  %v389_v59 = vld [vmem:[#allocation2 + $0x141] sm:$0xff]  ;;  %v392_v60 = vld [vmem:[#allocation2 + $0x169] sm:$0xff]  ;;  %v3157_v7 = vld [vmem:[#allocation2 + $0x52] sm:$0xff] }
  0x46   : > { %v391_v61 = vld [vmem:[#allocation2 + $0x159] sm:$0xff]  ;;  %v393_v63 = vld [vmem:[#allocation2 + $0x171] sm:$0xff]  ;;  %v3153_v6 = vld [vmem:[#allocation2 + $0x62] sm:$0xff] }
  0x47   : > { %v3161_v8 = vld [vmem:[#allocation2 + $0x7a] sm:$0xff]  ;;  %v3165_v9 = vld [vmem:[#allocation2 + $0x6a] sm:$0xff]  ;;  %v3169_v10 = vld [vmem:[#allocation2 + $0x92] sm:$0xff] }
  0x48   : > { %v3173_v11 = vld [vmem:[#allocation2 + $0x82] sm:$0xff]  ;;  %v3177_v12 = vld [vmem:[#allocation2 + $0xaa] sm:$0xff]  ;;  %v3181_v13 = vld [vmem:[#allocation2 + $0x9a] sm:$0xff] }
  0x49   : > { %669 = vrot.lane.b32.xlu1 %v3091_v41, %s2849_s6  ;;  %675 = vrot.lane.b32.xlu0 %v3095_v42, %s2849_s6  ;;  %v3185_v14 = vld [vmem:[#allocation2 + $0xc2] sm:$0xff]  ;;  %v3189_v15 = vld [vmem:[#allocation2 + $0xb2] sm:$0xff]  ;;  %v3193_v16 = vld [vmem:[#allocation2 + $0xda] sm:$0xff] }
  0x4a   : > { %v3197_v17 = vld [vmem:[#allocation2 + $0xca] sm:$0xff]  ;;  %v414_v18 = vld [vmem:[#allocation2 + $0xf2] sm:$0xff]  ;;  %v3203_v19 = vld [vmem:[#allocation2 + $0xe2] sm:$0xff] }
  0x4b   : > { %v416_v20 = vld [vmem:[#allocation2 + $0x10a] sm:$0xff]  ;;  %v415_v21 = vld [vmem:[#allocation2 + $0xfa] sm:$0xff]  ;;  %v418_v22 = vld [vmem:[#allocation2 + $0x122] sm:$0xff] }
  0x4c   : > { %v417_v23 = vld [vmem:[#allocation2 + $0x112] sm:$0xff]  ;;  %v420_v24 = vld [vmem:[#allocation2 + $0x13a] sm:$0xff]  ;;  %v419_v29 = vld [vmem:[#allocation2 + $0x12a] sm:$0xff] }
  0x4d   : > { %673 = vrot.lane.b32.xlu1 %v3099_v43, %s2849_s6  ;;  %679 = vrot.lane.b32.xlu0 %v3103_v44, %s2849_s6  ;;  %v422_v33 = vld [vmem:[#allocation2 + $0x152] sm:$0xff]  ;;  %v421_v35 = vld [vmem:[#allocation2 + $0x142] sm:$0xff]  ;;  %v424_v37 = vld [vmem:[#allocation2 + $0x16a] sm:$0xff] }
  0x51   : > { %677 = vrot.lane.b32.xlu1 %v3107_v45, %s2849_s6  ;;  %683 = vrot.lane.b32.xlu0 %v378_v46, %s2849_s6  ;;  %v423_v46 = vld [vmem:[#allocation2 + $0x15a] sm:$0xff] }
  0x55   : > { %681 = vrot.lane.b32.xlu1 %v3113_v47, %s2849_s6  ;;  %687 = vrot.lane.b32.xlu0 %v380_v48, %s2849_s6 }
  0x59   : > { %685 = vrot.lane.b32.xlu1 %v379_v49, %s2849_s6  ;;  %691 = vrot.lane.b32.xlu0 %v382_v50, %s2849_s6  ;;  %v3230_v50 = vld [vmem:[#allocation2 + $0x18] sm:$0xff] }
  0x5d   : > { %689 = vrot.lane.b32.xlu1 %v381_v51, %s2849_s6  ;;  %695 = vrot.lane.b32.xlu0 %v384_v52, %s2849_s6  ;;  %v425_v51 = vld [vmem:[#allocation2 + $0x172] sm:$0xff] }
  0x61   : > { %693 = vrot.lane.b32.xlu1 %v383_v53, %s2849_s6  ;;  %699 = vrot.lane.b32.xlu0 %v386_v54, %s2849_s6  ;;  %v3239_v54 = vld [vmem:[#allocation2 + $0x30] sm:$0xff] }
  0x65   : > { %697 = vrot.lane.b32.xlu1 %v385_v55, %s2849_s6  ;;  %703 = vrot.lane.b32.xlu0 %v388_v56, %s2849_s6  ;;  %v3245_v56 = vld [vmem:[#allocation2 + $0x20] sm:$0xff] }
  0x69   : > { %701 = vrot.lane.b32.xlu1 %v387_v57, %s2849_s6  ;;  %707 = vrot.lane.b32.xlu0 %v390_v58, %s2849_s6  ;;  %v3251_v58 = vld [vmem:[#allocation2 + $0x48] sm:$0xff] }
  0x6d   : > { %705 = vrot.lane.b32.xlu1 %v389_v59, %s2849_s6  ;;  %711 = vrot.lane.b32.xlu0 %v392_v60, %s2849_s6  ;;  %v3257_v60 = vld [vmem:[#allocation2 + $0x38] sm:$0xff] }
  0x71   : > { %709 = vrot.lane.b32.xlu1 %v391_v61, %s2849_s6  ;;  %779 = vrot.lane.b32.xlu0 %v394_v62, %s2850_s7  ;;  %v3263_v62 = vld [vmem:[#allocation2 + $0x60] sm:$0xff] }
  0x75   : > { %713 = vrot.lane.b32.xlu1 %v393_v63, %s2849_s6  ;;  %783 = vrot.lane.b32.xlu0 %v3133_v0, %s2850_s7 }
  0x79   : > { %781 = vrot.lane.b32.xlu1 %v395_v1, %s2850_s7  ;;  %787 = vrot.lane.b32.xlu0 %v3138_v2, %s2850_s7  ;;  %v3269_v1 = vld [vmem:[#allocation2 + $0x50] sm:$0xff] }
  0x7d   : > { %785 = vrot.lane.b32.xlu1 %v3141_v3, %s2850_s7  ;;  %791 = vrot.lane.b32.xlu0 %v3145_v4, %s2850_s7 }
  0x81   : > { %789 = vrot.lane.b32.xlu1 %v3149_v5, %s2850_s7  ;;  %795 = vrot.lane.b32.xlu0 %v3153_v6, %s2850_s7 }
  0x85   : > { %793 = vrot.lane.b32.xlu1 %v3157_v7, %s2850_s7  ;;  %799 = vrot.lane.b32.xlu0 %v3161_v8, %s2850_s7 }
  0x89   : > { %797 = vrot.lane.b32.xlu1 %v3165_v9, %s2850_s7  ;;  %803 = vrot.lane.b32.xlu0 %v3169_v10, %s2850_s7 }
  0x8d   : > { %801 = vrot.lane.b32.xlu1 %v3173_v11, %s2850_s7  ;;  %807 = vrot.lane.b32.xlu0 %v3177_v12, %s2850_s7 }
  0x91   : > { %805 = vrot.lane.b32.xlu1 %v3181_v13, %s2850_s7  ;;  %811 = vrot.lane.b32.xlu0 %v3185_v14, %s2850_s7  ;;  %v3211_v28 = vpop.permute.xlu0 %651 }
  0x95   : > { %809 = vrot.lane.b32.xlu1 %v3189_v15, %s2850_s7  ;;  %815 = vrot.lane.b32.xlu0 %v3193_v16, %s2850_s7 }
  0x99   : > { %813 = vrot.lane.b32.xlu1 %v3197_v17, %s2850_s7  ;;  %819 = vrot.lane.b32.xlu0 %v414_v18, %s2850_s7 }
  0x9d   : > { %817 = vrot.lane.b32.xlu1 %v3203_v19, %s2850_s7  ;;  %823 = vrot.lane.b32.xlu0 %v416_v20, %s2850_s7  ;;  %v3275_v20 = vld [vmem:[#allocation2 + $0x78] sm:$0xff] }
  0xa1   : > { %821 = vrot.lane.b32.xlu1 %v415_v21, %s2850_s7  ;;  %827 = vrot.lane.b32.xlu0 %v418_v22, %s2850_s7  ;;  %v3281_v22 = vld [vmem:[#allocation2 + $0x68] sm:$0xff] }
  0xa2   : > { %v3215_v34 = vpop.permute.xlu0 %653 }
  0xa5   : > { %825 = vrot.lane.b32.xlu1 %v417_v23, %s2850_s7  ;;  %831 = vrot.lane.b32.xlu0 %v420_v24, %s2850_s7  ;;  %v3287_v24 = vld [vmem:[#allocation2 + $0x90] sm:$0xff] }
  0xa6   : > { %4396 = vst [vmem:[#allocation11_spill] sm:$0xff] %v3287_v24 }
  0xa9   : > { %829 = vrot.lane.b32.xlu1 %v419_v29, %s2850_s7  ;;  %835 = vrot.lane.b32.xlu0 %v422_v33, %s2850_s7  ;;  %v3293_v33 = vld [vmem:[#allocation2 + $0x80] sm:$0xff] }
  0xab   : > { %v3219_v36 = vpop.permute.xlu1 %655  ;;  %v3221_v39 = vpop.permute.xlu0 %659 }
  0xad   : > { %833 = vrot.lane.b32.xlu1 %v421_v35, %s2850_s7  ;;  %839 = vrot.lane.b32.xlu0 %v424_v37, %s2850_s7  ;;  %v1906_v35 = vld [vmem:[%s4381_s1] sm:$0xff]  ;;  %v1907_v37 = vld [vmem:[%s4381_s1 + $0x8] sm:$0xff] }
  0xaf   : > { %v3225_v48 = vpop.permute.xlu1 %657  ;;  %v3227_v49 = vpop.permute.xlu0 %663 }
  0xb1   : > { %837 = vrot.lane.b32.xlu1 %v423_v46, %s2850_s7  ;;  %907 = vrot.lane.b32.xlu0 %v3230_v50, %s2851_s8 }
  0xb3   : > { %v3234_v52 = vpop.permute.xlu1 %661  ;;  %v3236_v53 = vpop.permute.xlu0 %667 }
  0xb5   : > { %841 = vrot.lane.b32.xlu1 %v425_v51, %s2850_s7  ;;  %911 = vrot.lane.b32.xlu0 %v3239_v54, %s2851_s8  ;;  %v2710_v51 = vpack.c.bf16 %v1907_v37, %v1906_v35  ;;  %s4029_s7 = scalar_lea.vmem %s4383_s3, %s2601_s28  ;;  %s2559_s28 = sshll.u32 %s196_s27, 1 }
  0xb6   : > { %s198_s10 = scalar_lea.vmem [#allocation3], %s2559_s28 }
  0xb7   : > { %v3243_v55 = vpop.permute.xlu1 %665  ;;  %v3247_v57 = vpop.permute.xlu0 %671  ;;  %2711 = vmatprep.subr.bf16.mxu0 %v2710_v51  ;;  %2726 = vmatprep.subr.bf16.mxu1 %v2710_v51  ;;  %s2471_s11 = sshll.u32 %s198_s10, 4  ;;  %s4340_s11 = int_to_ptr.vmem [resolvable:$true] %s2471_s11 }
  0xb8   : > { %2713 = vmatpush3.bf16.msra.mxu0 %v2710_v51  ;;  %2731 = vmatpush3.bf16.msra.mxu1 %v2710_v51  ;;  %v1913_v51 = vld [vmem:[%s4381_s1 + $0x38] sm:$0xff]  ;;  %s2784_s22 = scalar_lea.vmem %s4340_s11, 32 }
  0xb9   : > { %909 = vrot.lane.b32.xlu1 %v3245_v56, %s2851_s8  ;;  %915 = vrot.lane.b32.xlu0 %v3251_v58, %s2851_s8  ;;  %p2785_p11 = scmp.ne.s32.totalorder %s4340_s11, %s2784_s22 }
  0xbb   : > { %v3255_v59 = vpop.permute.xlu1 %669  ;;  %v3259_v61 = vpop.permute.xlu0 %675  ;;  %p2786_p12 = pnand %p2785_p11, %p2921_p5 }
  0xbc   : > { %4391 = vst [vmem:[#allocation6_spill] sm:$0xff] %v3259_v61  ;;  %v1910_v61 = vld [vmem:[%s4381_s1 + $0x20] sm:$0xff] }
  0xbd   : > { %913 = vrot.lane.b32.xlu1 %v3257_v60, %s2851_s8  ;;  %919 = vrot.lane.b32.xlu0 %v3263_v62, %s2851_s8  ;;  %p2787_p13 = pneg %p2786_p12 }
  0xbf   : > { %v3267_v63 = vpop.permute.xlu1 %673  ;;  %v3271_v18 = vpop.permute.xlu0 %679 }
  0xc0   : > { %4392 = vst [vmem:[#allocation7_spill] sm:$0xff] %v3267_v63  ;;  %4393 = vst [vmem:[#allocation8_spill] sm:$0xff] %v3271_v18  ;;  %v3311_v18 = vld [vmem:[#allocation2 + $0x98] sm:$0xff] }
  0xc1   : > { %917 = vrot.lane.b32.xlu1 %v3269_v1, %s2851_s8  ;;  %923 = vrot.lane.b32.xlu0 %v3275_v20, %s2851_s8  ;;  %4401 = vst [vmem:[#allocation16_spill] sm:$0xff] %v3311_v18 }
  0xc3   : > { %v3279_v21 = vpop.permute.xlu1 %677  ;;  %v3283_v23 = vpop.permute.xlu0 %683 }
  0xc4   : > { %4394 = vst [vmem:[#allocation9_spill] sm:$0xff] %v3279_v21  ;;  %4395 = vst [vmem:[#allocation10_spill] sm:$0xff] %v3283_v23  ;;  %v3305_v23 = vld [vmem:[#allocation2 + $0xa8] sm:$0xff]  ;;  %v1908_v21 = vld [vmem:[%s4381_s1 + $0x10] sm:$0xff] }
  0xc5   : > { %921 = vrot.lane.b32.xlu1 %v3281_v22, %s2851_s8  ;;  %927 = vrot.lane.b32.xlu0 %v3287_v24, %s2851_s8  ;;  %4399 = vst [vmem:[#allocation14_spill] sm:$0xff] %v3305_v23 }
  0xc7   : > { %v3291_v29 = vpop.permute.xlu1 %681  ;;  %v3301_v46 = vpop.permute.xlu0 %687 }
  0xc8   : > { %4397 = vst [vmem:[#allocation12_spill] sm:$0xff] %v3291_v29  ;;  %4398 = vst [vmem:[#allocation13_spill] sm:$0xff] %v3301_v46  ;;  %v1909_v46 = vld [vmem:[%s4381_s1 + $0x18] sm:$0xff] }
  0xc9   : > { %925 = vrot.lane.b32.xlu1 %v3293_v33, %s2851_s8  ;;  %931 = vrot.lane.b32.xlu0 %v3305_v23, %s2851_s8  ;;  %v2714_v37 = vpack.c.bf16 %v1909_v46, %v1908_v21  ;;  %v1912_v46 = vld [vmem:[%s4381_s1 + $0x30] sm:$0xff] }
  0xcb   : > { %v3309_v29 = vpop.permute.xlu1 %685  ;;  %v3319_v35 = vpop.permute.xlu0 %691  ;;  %2715 = vmatprep.subr.bf16.mxu0 %v2714_v37  ;;  %2727 = vmatprep.subr.bf16.mxu1 %v2714_v37 }
  0xcc   : > { %4400 = vst [vmem:[#allocation15_spill] sm:$0xff] %v3309_v29  ;;  %4402 = vst [vmem:[#allocation17_spill] sm:$0xff] %v3319_v35  ;;  %2717 = vmatpush3.bf16.msra.mxu0 %v2714_v37  ;;  %v1911_v35 = vld [vmem:[%s4381_s1 + $0x28] sm:$0xff]  ;;  %2732 = vmatpush3.bf16.msra.mxu1 %v2714_v37 }
  0xcd   : > { %929 = vrot.lane.b32.xlu1 %v3311_v18, %s2851_s8  ;;  %1037 = vrot.lane.b32.xlu0 %v3051_v27, %s2852_s23  ;;  %v2718_v21 = vpack.c.bf16 %v1911_v35, %v1910_v61  ;;  %v2722_v61 = vpack.c.bf16 %v1913_v51, %v1912_v46 }
  0xcf   : > { %v3325_v29 = vpop.permute.xlu1 %689  ;;  %v3333_v63 = vpop.permute.xlu0 %695  ;;  %2719 = vmatprep.subr.bf16.mxu0 %v2718_v21  ;;  %2728 = vmatprep.subr.bf16.mxu1 %v2718_v21 }
  0xd0   : > { %4403 = vst [vmem:[#allocation18_spill] sm:$0xff] %v3325_v29  ;;  %4404 = vst [vmem:[#allocation19_spill] sm:$0xff] %v3333_v63  ;;  %2721 = vmatpush3.bf16.msra.mxu0 %v2718_v21  ;;  %2733 = vmatpush3.bf16.msra.mxu1 %v2718_v21 }
  0xd1   : > { %1035 = vrot.lane.b32.xlu1 %v3042_v25, %s2852_s23  ;;  %1165 = vrot.lane.b32.xlu0 %v3141_v3, %s2853_s9 }
  0xd2   : > { %2723 = vmatprep.subr.bf16.mxu0 %v2722_v61  ;;  %2729 = vmatprep.subr.bf16.mxu1 %v2722_v61 }
  0xd3   : > { %v3339_v27 = vpop.permute.xlu1 %693  ;;  %v3347_v25 = vpop.permute.xlu0 %699 }
  0xd4   : > { %4405 = vst [vmem:[#allocation20_spill] sm:$0xff] %v3339_v27  ;;  %4406 = vst [vmem:[#allocation21_spill] sm:$0xff] %v3347_v25  ;;  %2725 = vmatpush3.bf16.msra.mxu0 %v2722_v61  ;;  %2734 = vmatpush3.bf16.msra.mxu1 %v2722_v61 }
  0xd5   : > { %1163 = vrot.lane.b32.xlu1 %v3133_v0, %s2853_s9  ;;  %1293 = vrot.lane.b32.xlu0 %v3257_v60, %s2854_s14  ;;  %v1914_v0 = vld [vmem:[%s4381_s1 + $0x40] sm:$0xff] }
  0xd6   : > { %2660 = vmatprep.subr.mxu0 %v1914_v0  ;;  %2730 = vmatprep.subr.mxu1 %v1914_v0 }
  0xd7   : > { %v3353_v3 = vpop.permute.xlu1 %697  ;;  %v3355_v35 = vpop.permute.xlu0 %703 }
  0xd8   : > { %4407 = vst [vmem:[#allocation22_spill] sm:$0xff] %v3353_v3  ;;  %4408 = vst [vmem:[#allocation23_spill] sm:$0xff] %v3355_v35  ;;  %2661 = vmatpush3.msra.mxu0 %v1914_v0  ;;  %2735 = vmatpush3.msra.mxu1 %v1914_v0 }
  0xd9   : > { %1291 = vrot.lane.b32.xlu1 %v3239_v54, %s2854_s14  ;;  %1039 = vrot.lane.b32.xlu0 %v3044_v26, %s2852_s23 }
  0xdb   : > { %v3364_v37 = vpop.permute.xlu1 %701  ;;  %v3366_v21 = vpop.permute.xlu0 %707 }
  0xdc   : > { %4409 = vst [vmem:[#allocation24_spill] sm:$0xff] %v3364_v37  ;;  %4410 = vst [vmem:[#allocation25_spill] sm:$0xff] %v3366_v21 }
  0xdd   : > { %1419 = vrot.lane.b32.xlu1 %v3044_v26, %s2855_s29  ;;  %1547 = vrot.lane.b32.xlu0 %v3138_v2, %s2856_s30 }
  0xdf   : > { %v3372_v46 = vpop.permute.xlu1 %705  ;;  %v3374_v51 = vpop.permute.xlu0 %711 }
  0xe0   : > { %4411 = vst [vmem:[#allocation26_spill] sm:$0xff] %v3372_v46  ;;  %4412 = vst [vmem:[#allocation27_spill] sm:$0xff] %v3374_v51 }
  0xe1   : > { %1421 = vrot.lane.b32.xlu1 %v3063_v31, %s2855_s29  ;;  %1167 = vrot.lane.b32.xlu0 %v3138_v2, %s2853_s9 }
  0xe3   : > { %v3380_v61 = vpop.permute.xlu1 %709  ;;  %v3382_v21 = vpop.permute.xlu0 %779 }
  0xe4   : > { %4413 = vst [vmem:[#allocation28_spill] sm:$0xff] %v3380_v61 }
  0xe5   : > { %1041 = vrot.lane.b32.xlu1 %v3063_v31, %s2852_s23  ;;  %1169 = vrot.lane.b32.xlu0 %v3149_v5, %s2853_s9 }
  0xe7   : > { %v3388_v26 = vpop.permute.xlu1 %713  ;;  %v3390_v0 = vpop.permute.xlu0 %783 }
  0xe8   : > { %4414 = vst [vmem:[#allocation29_spill] sm:$0xff] %v3388_v26 }
  0xe9   : > { %1549 = vrot.lane.b32.xlu1 %v3149_v5, %s2856_s30  ;;  %1297 = vrot.lane.b32.xlu0 %v3269_v1, %s2854_s14 }
  0xeb   : > { %v3396_v2 = vpop.permute.xlu1 %781  ;;  %v3398_v51 = vpop.permute.xlu0 %787 }
  0xed   : > { %1295 = vrot.lane.b32.xlu1 %v3251_v58, %s2854_s14  ;;  %1043 = vrot.lane.b32.xlu0 %v3059_v30, %s2852_s23 }
  0xef   : > { %v3404_v31 = vpop.permute.xlu1 %785  ;;  %v3406_v26 = vpop.permute.xlu0 %791 }
  0xf1   : > { %1423 = vrot.lane.b32.xlu1 %v3059_v30, %s2855_s29  ;;  %1551 = vrot.lane.b32.xlu0 %v3145_v4, %s2856_s30 }
  0xf3   : > { %v3412_v5 = vpop.permute.xlu1 %789  ;;  %v3414_v61 = vpop.permute.xlu0 %795 }
  0xf5   : > { %1425 = vrot.lane.b32.xlu1 %v3079_v38, %s2855_s29  ;;  %1171 = vrot.lane.b32.xlu0 %v3145_v4, %s2853_s9 }
  0xf7   : > { %v3420_v46 = vpop.permute.xlu1 %793  ;;  %v3422_v35 = vpop.permute.xlu0 %799 }
  0xf9   : > { %1045 = vrot.lane.b32.xlu1 %v3079_v38, %s2852_s23  ;;  %1173 = vrot.lane.b32.xlu0 %v3157_v7, %s2853_s9 }
  0xfb   : > { %v3428_v30 = vpop.permute.xlu1 %797  ;;  %v3430_v37 = vpop.permute.xlu0 %803 }
  0xfc   : > { %4415 = vst [vmem:[#allocation30_spill] sm:$0xff] %v3430_v37 }
  0xfd   : > { %1553 = vrot.lane.b32.xlu1 %v3157_v7, %s2856_s30  ;;  %1301 = vrot.lane.b32.xlu0 %v3281_v22, %s2854_s14 }
  0xff   : > { %v3436_v4 = vpop.permute.xlu1 %801  ;;  %v3438_v25 = vpop.permute.xlu0 %807 }
 0x100   : > { %4416 = vst [vmem:[#allocation31_spill] sm:$0xff] %v3438_v25  ;;  %v330_v25 = vld [vmem:[#allocation2] sm:$0xff] }
 0x101   : > { %1299 = vrot.lane.b32.xlu1 %v3263_v62, %s2854_s14  ;;  %1047 = vrot.lane.b32.xlu0 %v3067_v32, %s2852_s23 }
 0x103   : > { %v3444_v38 = vpop.permute.xlu1 %805  ;;  %v3446_v3 = vpop.permute.xlu0 %811 }
 0x104   : > { %4417 = vst [vmem:[#allocation32_spill] sm:$0xff] %v3444_v38  ;;  %4418 = vst [vmem:[#allocation33_spill] sm:$0xff] %v3446_v3  ;;  %v1643_v38 = vsel %vm209_vm0, %v330_v25, %v3211_v28 }
 0x105   : > { %1427 = vrot.lane.b32.xlu1 %v3067_v32, %s2855_s29  ;;  %1555 = vrot.lane.b32.xlu0 %v3153_v6, %s2856_s30 }
 0x107   : > { %v3452_v7 = vpop.permute.xlu1 %809  ;;  %v3454_v63 = vpop.permute.xlu0 %815 }
 0x108   : > { %4419 = vst [vmem:[#allocation34_spill] sm:$0xff] %v3452_v7  ;;  %4420 = vst [vmem:[#allocation35_spill] sm:$0xff] %v3454_v63 }
 0x109   : > { %1429 = vrot.lane.b32.xlu1 %v3091_v41, %s2855_s29  ;;  %1175 = vrot.lane.b32.xlu0 %v3153_v6, %s2853_s9 }
 0x10b   : > { %v3460_v27 = vpop.permute.xlu1 %813  ;;  %v3462_v29 = vpop.permute.xlu0 %819 }
 0x10c   : > { %4421 = vst [vmem:[#allocation36_spill] sm:$0xff] %v3460_v27  ;;  %4422 = vst [vmem:[#allocation37_spill] sm:$0xff] %v3462_v29 }
 0x10d   : > { %1049 = vrot.lane.b32.xlu1 %v3091_v41, %s2852_s23  ;;  %1177 = vrot.lane.b32.xlu0 %v3165_v9, %s2853_s9 }
 0x10f   : > { %v3468_v32 = vpop.permute.xlu1 %817  ;;  %v3470_v3 = vpop.permute.xlu0 %823 }
 0x110   : > { %4423 = vst [vmem:[#allocation38_spill] sm:$0xff] %v3468_v32  ;;  %4424 = vst [vmem:[#allocation39_spill] sm:$0xff] %v3470_v3 }
 0x111   : > { %1557 = vrot.lane.b32.xlu1 %v3165_v9, %s2856_s30  ;;  %1305 = vrot.lane.b32.xlu0 %v3293_v33, %s2854_s14 }
 0x113   : > { %v3476_v6 = vpop.permute.xlu1 %821  ;;  %v3478_v63 = vpop.permute.xlu0 %827 }
 0x114   : > { %4425 = vst [vmem:[#allocation40_spill] sm:$0xff] %v3476_v6  ;;  %4426 = vst [vmem:[#allocation41_spill] sm:$0xff] %v3478_v63  ;;  %v3552_v6 = vld [vmem:[#allocation2 + $0xb0] sm:$0xff] }
 0x115   : > { %1303 = vrot.lane.b32.xlu1 %v3275_v20, %s2854_s14  ;;  %1051 = vrot.lane.b32.xlu0 %v3087_v40, %s2852_s23  ;;  %4435 = vst [vmem:[#allocation50_spill] sm:$0xff] %v3552_v6 }
 0x117   : > { %v3484_v41 = vpop.permute.xlu1 %825  ;;  %v3486_v29 = vpop.permute.xlu0 %831 }
 0x118   : > { %4427 = vst [vmem:[#allocation42_spill] sm:$0xff] %v3484_v41  ;;  %4428 = vst [vmem:[#allocation43_spill] sm:$0xff] %v3486_v29 }
 0x119   : > { %1431 = vrot.lane.b32.xlu1 %v3087_v40, %s2855_s29  ;;  %1559 = vrot.lane.b32.xlu0 %v3161_v8, %s2856_s30 }
 0x11b   : > { %v3492_v9 = vpop.permute.xlu1 %829  ;;  %v3494_v3 = vpop.permute.xlu0 %835 }
 0x11c   : > { %4429 = vst [vmem:[#allocation44_spill] sm:$0xff] %v3492_v9  ;;  %4430 = vst [vmem:[#allocation45_spill] sm:$0xff] %v3494_v3 }
 0x11d   : > { %1433 = vrot.lane.b32.xlu1 %v3099_v43, %s2855_s29  ;;  %1179 = vrot.lane.b32.xlu0 %v3161_v8, %s2853_s9 }
 0x11f   : > { %v3500_v63 = vpop.permute.xlu1 %833  ;;  %v3502_v41 = vpop.permute.xlu0 %839 }
 0x120   : > { %4431 = vst [vmem:[#allocation46_spill] sm:$0xff] %v3500_v63  ;;  %4432 = vst [vmem:[#allocation47_spill] sm:$0xff] %v3502_v41 }
 0x121   : > { %1053 = vrot.lane.b32.xlu1 %v3099_v43, %s2852_s23  ;;  %1181 = vrot.lane.b32.xlu0 %v3173_v11, %s2853_s9 }
 0x123   : > { %v3508_v40 = vpop.permute.xlu1 %837  ;;  %v908_v29 = vpop.permute.xlu0 %907 }
 0x124   : > { %4433 = vst [vmem:[#allocation48_spill] sm:$0xff] %v3508_v40 }
 0x125   : > { %1561 = vrot.lane.b32.xlu1 %v3173_v11, %s2856_s30  ;;  %1309 = vrot.lane.b32.xlu0 %v3311_v18, %s2854_s14 }
 0x127   : > { %v3514_v8 = vpop.permute.xlu1 %841  ;;  %v3516_v3 = vpop.permute.xlu0 %911 }
 0x128   : > { %4434 = vst [vmem:[#allocation49_spill] sm:$0xff] %v3514_v8 }
 0x129   : > { %1307 = vrot.lane.b32.xlu1 %v3287_v24, %s2854_s14  ;;  %1055 = vrot.lane.b32.xlu0 %v3095_v42, %s2852_s23  ;;  %v3586_v24 = vld [vmem:[#allocation2 + $0xc0] sm:$0xff] }
 0x12b   : > { %v3522_v43 = vpop.permute.xlu1 %909  ;;  %v3524_v41 = vpop.permute.xlu0 %915 }
 0x12d   : > { %1435 = vrot.lane.b32.xlu1 %v3095_v42, %s2855_s29  ;;  %1563 = vrot.lane.b32.xlu0 %v3169_v10, %s2856_s30 }
 0x12f   : > { %v3530_v11 = vpop.permute.xlu1 %913  ;;  %v3532_v8 = vpop.permute.xlu0 %919 }
 0x131   : > { %1437 = vrot.lane.b32.xlu1 %v3107_v45, %s2855_s29  ;;  %1183 = vrot.lane.b32.xlu0 %v3169_v10, %s2853_s9 }
 0x133   : > { %v3538_v40 = vpop.permute.xlu1 %917  ;;  %v3540_v63 = vpop.permute.xlu0 %923 }
 0x135   : > { %1057 = vrot.lane.b32.xlu1 %v3107_v45, %s2852_s23  ;;  %1185 = vrot.lane.b32.xlu0 %v3181_v13, %s2853_s9 }
 0x137   : > { %v3546_v42 = vpop.permute.xlu1 %921  ;;  %v3548_v9 = vpop.permute.xlu0 %927 }
 0x139   : > { %1565 = vrot.lane.b32.xlu1 %v3181_v13, %s2856_s30  ;;  %1313 = vrot.lane.b32.xlu0 %v3552_v6, %s2854_s14 }
 0x13b   : > { %v3556_v10 = vpop.permute.xlu1 %925  ;;  %v3558_v32 = vpop.permute.xlu0 %931 }
 0x13c   : > { %4436 = vst [vmem:[#allocation51_spill] sm:$0xff] %v3558_v32  ;;  %v1676_v32 = vsel %vm1675_vm2, %v1643_v38, %v3382_v21  ;;  %v3595_v38 = vld [vmem:[#allocation2 + $0xc8] sm:$0xff] }
 0x13d   : > { %1311 = vrot.lane.b32.xlu1 %v3305_v23, %s2854_s14  ;;  %933 = vrot.lane.b32.xlu0 %v3552_v6, %s2851_s8  ;;  %v1709_v18 = vsel %vm1708_vm3, %v1676_v32, %v908_v29 }
 0x13f   : > { %v3564_v45 = vpop.permute.xlu1 %929  ;;  %v1038_v27 = vpop.permute.xlu0 %1037 }
 0x141   : > { %1439 = vrot.lane.b32.xlu1 %v3103_v44, %s2855_s29  ;;  %1441 = vrot.lane.b32.xlu0 %v3113_v47, %s2855_s29 }
 0x143   : > { %v1036_v13 = vpop.permute.xlu1 %1035  ;;  %v1166_v7 = vpop.permute.xlu0 %1165 }
 0x145   : > { %1059 = vrot.lane.b32.xlu1 %v3103_v44, %s2852_s23  ;;  %1061 = vrot.lane.b32.xlu0 %v3113_v47, %s2852_s23  ;;  %v1742_v47 = vsel %vm1741_vm4, %v1709_v18, %v1036_v13 }
 0x147   : > { %v1164_v23 = vpop.permute.xlu1 %1163  ;;  %v1294_v6 = vpop.permute.xlu0 %1293 }
 0x148   : > { %v1775_v28 = vsel %vm1774_vm5, %v1742_v47, %v1164_v23  ;;  %v567_v47 = vld [vmem:[#allocation2 + $0xc1] sm:$0xff] }
 0x149   : > { %1567 = vrot.lane.b32.xlu1 %v3177_v12, %s2856_s30  ;;  %1569 = vrot.lane.b32.xlu0 %v3189_v15, %s2856_s30 }
 0x14b   : > { %v1292_v44 = vpop.permute.xlu1 %1291  ;;  %v1040_v37 = vpop.permute.xlu0 %1039 }
 0x14c   : > { %v1808_v25 = vsel %vm1807_vm7, %v1775_v28, %v1292_v44 }
 0x14d   : > { %1187 = vrot.lane.b32.xlu1 %v3177_v12, %s2853_s9  ;;  %1315 = vrot.lane.b32.xlu0 %v3586_v24, %s2854_s14  ;;  %v331_v12 = vld [vmem:[#allocation2 + $0x8] sm:$0xff] }
 0x14e   : > { %v1644_v13 = vsel %vm209_vm0, %v331_v12, %v3215_v34 }
 0x14f   : > { %v1420_v29 = vpop.permute.xlu1 %1419  ;;  %v1548_v21 = vpop.permute.xlu0 %1547 }
 0x150   : > { %v1841_v18 = vsel %vm1840_vm6, %v1808_v25, %v1420_v29 }
 0x151   : > { %1189 = vrot.lane.b32.xlu1 %v3189_v15, %s2853_s9  ;;  %v1874_v23 = vsel %vm1873_vm8, %v1841_v18, %v1548_v21  ;;  %1317 = vrot.lane.b32.xlu0 %v3595_v38, %s2854_s14  ;;  %v1677_v15 = vsel %vm1675_vm2, %v1644_v13, %v3396_v2  ;;  %v568_v18 = vld [vmem:[#allocation2 + $0xc9] sm:$0xff] }
 0x152   : > { %2662 = vmatprep.mubr.msk.f32.mxu0 %vm1922_vm9, %v1874_v23  ;;  %v1710_v28 = vsel %vm1708_vm3, %v1677_v15, %v3522_v43 }
 0x153   : > { %v1422_v32 = vpop.permute.xlu1 %1421  ;;  %v1168_v44 = vpop.permute.xlu0 %1167  ;;  %v1743_v29 = vsel %vm1741_vm4, %v1710_v28, %v1038_v27  ;;  %v1645_v27 = vsel %vm209_vm0, %v3230_v50, %v3219_v36 }
 0x154   : > { %v1776_v34 = vsel %vm1774_vm5, %v1743_v29, %v1166_v7  ;;  %v1678_v7 = vsel %vm1675_vm2, %v1645_v27, %v3390_v0 }
 0x155   : > { %935 = vrot.lane.b32.xlu1 %v3586_v24, %s2851_s8  ;;  %937 = vrot.lane.b32.xlu0 %v3595_v38, %s2851_s8  ;;  %v1809_v12 = vsel %vm1807_vm7, %v1776_v34, %v1294_v6 }
 0x156   : > { %v1842_v2 = vsel %vm1840_vm6, %v1809_v12, %v1422_v32  ;;  %v1711_v32 = vsel %vm1708_vm3, %v1678_v7, %v3516_v3  ;;  %v3638_v3 = vld [vmem:[#allocation2 + $0xd8] sm:$0xff]  ;;  %v570_v7 = vld [vmem:[#allocation2 + $0xe1] sm:$0xff] }
 0x157   : > { %v1042_v25 = vpop.permute.xlu1 %1041  ;;  %v1170_v21 = vpop.permute.xlu0 %1169  ;;  %v1744_v15 = vsel %vm1741_vm4, %v1711_v32, %v1040_v37 }
 0x159   : > { %1443 = vrot.lane.b32.xlu1 %v567_v47, %s2855_s29  ;;  %1445 = vrot.lane.b32.xlu0 %v568_v18, %s2855_s29 }
 0x15b   : > { %v1550_v23 = vpop.permute.xlu1 %1549  ;;  %v1298_v13 = vpop.permute.xlu0 %1297 }
 0x15c   : > { %v1875_v43 = vsel %vm1873_vm8, %v1842_v2, %v1550_v23  ;;  %v3653_v2 = vld [vmem:[#allocation2 + $0xe0] sm:$0xff] }
 0x15d   : > { %1063 = vrot.lane.b32.xlu1 %v567_v47, %s2852_s23  ;;  %2663 = vmatmul.mubr.msk.f32.vlgmr.msra.gmra.mrb[0].mxu0 %vm1922_vm9, %v1875_v43  ;;  %v1777_v47 = vsel %vm1774_vm5, %v1744_v15, %v1168_v44  ;;  %v1646_v44 = vsel %vm209_vm0, %v3245_v56, %v3225_v48 }
 0x15e   : > { %1065 = vrot.lane.b32.xlu0 %v568_v18, %s2852_s23  ;;  %v1679_v34 = vsel %vm1675_vm2, %v1646_v44, %v3404_v31 }
 0x15f   : > { %v1296_v6 = vpop.permute.xlu1 %1295  ;;  %v1044_v28 = vpop.permute.xlu0 %1043 }
 0x160   : > { %v1810_v29 = vsel %vm1807_vm7, %v1777_v47, %v1296_v6 }
 0x161   : > { %1571 = vrot.lane.b32.xlu1 %v3185_v14, %s2856_s30 }
 0x162   : > { %1573 = vrot.lane.b32.xlu0 %v3197_v17, %s2856_s30 }
 0x163   : > { %v1424_v36 = vpop.permute.xlu1 %1423  ;;  %v1552_v0 = vpop.permute.xlu0 %1551 }
 0x164   : > { %v1843_v50 = vsel %vm1840_vm6, %v1810_v29, %v1424_v36 }
 0x165   : > { %1191 = vrot.lane.b32.xlu1 %v3185_v14, %s2853_s9  ;;  %v1876_v37 = vsel %vm1873_vm8, %v1843_v50, %v1552_v0  ;;  %v1712_v14 = vsel %vm1708_vm3, %v1679_v34, %v3530_v11  ;;  %v569_v11 = vld [vmem:[#allocation2 + $0xd9] sm:$0xff]  ;;  %v3696_v34 = vld [vmem:[#allocation2 + $0xf0] sm:$0xff] }
 0x166   : > { %1319 = vrot.lane.b32.xlu0 %v3638_v3, %s2854_s14  ;;  %2665 = vmatprep.mubr.msk.f32.mxu0 %vm1922_vm9, %v1876_v37  ;;  %v1745_v48 = vsel %vm1741_vm4, %v1712_v14, %v1042_v25  ;;  %v506_v0 = vld [vmem:[#allocation2 + $0xda] sm:$0xff] }
 0x167   : > { %v1426_v18 = vpop.permute.xlu1 %1425  ;;  %v1172_v12 = vpop.permute.xlu0 %1171  ;;  %v1778_v23 = vsel %vm1774_vm5, %v1745_v48, %v1170_v21  ;;  %v1647_v21 = vsel %vm209_vm0, %v3239_v54, %v3221_v39 }
 0x168   : > { %v1811_v31 = vsel %vm1807_vm7, %v1778_v23, %v1298_v13  ;;  %v1680_v13 = vsel %vm1675_vm2, %v1647_v21, %v3398_v51 }
 0x169   : > { %1193 = vrot.lane.b32.xlu1 %v3197_v17, %s2853_s9  ;;  %v1844_v27 = vsel %vm1840_vm6, %v1811_v31, %v1426_v18  ;;  %v1713_v15 = vsel %vm1708_vm3, %v1680_v13, %v3524_v41 }
 0x16a   : > { %1321 = vrot.lane.b32.xlu0 %v3653_v2, %s2854_s14  ;;  %v1746_v47 = vsel %vm1741_vm4, %v1713_v15, %v1044_v28  ;;  %v1648_v28 = vsel %vm209_vm0, %v3257_v60, %v3234_v52  ;;  %v507_v52 = vld [vmem:[#allocation2 + $0xe2] sm:$0xff] }
 0x16b   : > { %v1046_v56 = vpop.permute.xlu1 %1045  ;;  %v1174_v43 = vpop.permute.xlu0 %1173  ;;  %v1779_v36 = vsel %vm1774_vm5, %v1746_v47, %v1172_v12  ;;  %v1681_v44 = vsel %vm1675_vm2, %v1648_v28, %v3412_v5  ;;  %v3703_v5 = vld [vmem:[#allocation2 + $0xf8] sm:$0xff] }
 0x16c   : > { %v1714_v18 = vsel %vm1708_vm3, %v1681_v44, %v3538_v40 }
 0x16d   : > { %939 = vrot.lane.b32.xlu1 %v3638_v3, %s2851_s8  ;;  %v1747_v14 = vsel %vm1741_vm4, %v1714_v18, %v1046_v56 }
 0x16e   : > { %941 = vrot.lane.b32.xlu0 %v3653_v2, %s2851_s8  ;;  %v1780_v60 = vsel %vm1774_vm5, %v1747_v14, %v1174_v43  ;;  %v1649_v43 = vsel %vm209_vm0, %v3251_v58, %v3227_v49  ;;  %v296_v58 = vld [vmem:[%s2997_s5 + $0xf8] sm:$0xff]  ;;  %v1651_v14 = vsel %vm209_vm0, %v3263_v62, %v3236_v53  ;;  %v573_v62 = vld [vmem:[#allocation2 + $0x109] sm:$0xff] }
 0x16f   : > { %v1554_v17 = vpop.permute.xlu1 %1553  ;;  %v1302_v6 = vpop.permute.xlu0 %1301  ;;  %329 = vst.msk [vmem:[#allocation2 + $0x189] sm:$0xff] %vm209_vm0, %v296_v58 }
 0x170   : > { %v1877_v25 = vsel %vm1873_vm8, %v1844_v27, %v1554_v17  ;;  %v1813_v40 = vsel %vm1807_vm7, %v1780_v60, %v1302_v6  ;;  %v295_v27 = vld [vmem:[%s2997_s5 + $0xf0] sm:$0xff]  ;;  %v1682_v17 = vsel %vm1675_vm2, %v1649_v43, %v3406_v26  ;;  %v572_v6 = vld [vmem:[#allocation2 + $0xf9] sm:$0xff] }
 0x171   : > { %1447 = vrot.lane.b32.xlu1 %v569_v11, %s2855_s29  ;;  %2666 = vmatmul.mubr.msk.f32.gmra.mrb[2].mxu0 %vm1922_vm9, %v1877_v25  ;;  %328 = vst.msk [vmem:[#allocation2 + $0x181] sm:$0xff] %vm209_vm0, %v295_v27 }
 0x172   : > { %1449 = vrot.lane.b32.xlu0 %v570_v7, %s2855_s29 }
 0x173   : > { %v1300_v32 = vpop.permute.xlu1 %1299  ;;  %v1048_v29 = vpop.permute.xlu0 %1047 }
 0x174   : > { %v1812_v50 = vsel %vm1807_vm7, %v1779_v36, %v1300_v32  ;;  %v1650_v36 = vsel %vm209_vm0, %v3269_v1, %v3243_v55 }
 0x175   : > { %1067 = vrot.lane.b32.xlu1 %v569_v11, %s2852_s23  ;;  %v571_v11 = vld [vmem:[#allocation2 + $0xf1] sm:$0xff] }
 0x176   : > { %1069 = vrot.lane.b32.xlu0 %v570_v7, %s2852_s23  ;;  %v1715_v7 = vsel %vm1708_vm3, %v1682_v17, %v3532_v8 }
 0x177   : > { %v1428_v39 = vpop.permute.xlu1 %1427  ;;  %v1556_v51 = vpop.permute.xlu0 %1555  ;;  %v1748_v21 = vsel %vm1741_vm4, %v1715_v7, %v1048_v29  ;;  %v603_v29 = vld [vmem:[#allocation2 + $0xf2] sm:$0xff] }
 0x178   : > { %v1845_v54 = vsel %vm1840_vm6, %v1812_v50, %v1428_v39  ;;  %v1683_v39 = vsel %vm1675_vm2, %v1650_v36, %v3420_v46 }
 0x179   : > { %1575 = vrot.lane.b32.xlu1 %v3193_v16, %s2856_s30  ;;  %v1878_v41 = vsel %vm1873_vm8, %v1845_v54, %v1556_v51  ;;  %v604_v54 = vld [vmem:[#allocation2 + $0xfa] sm:$0xff]  ;;  %v1716_v51 = vsel %vm1708_vm3, %v1683_v39, %v3546_v42 }
 0x17a   : > { %1577 = vrot.lane.b32.xlu0 %v3203_v19, %s2856_s30  ;;  %2668 = vmatprep.mubr.msk.f32.mxu0 %vm1922_vm9, %v1878_v41  ;;  %v4437_v39 = vld [vmem:[#allocation7_spill] sm:$0xff] }
 0x17b   : > { %v1430_v37 = vpop.permute.xlu1 %1429  ;;  %v1176_v16 = vpop.permute.xlu0 %1175 }
 0x17c   : > { %v1846_v48 = vsel %vm1840_vm6, %v1813_v40, %v1430_v37  ;;  %v1781_v49 = vsel %vm1774_vm5, %v1748_v21, %v1176_v16  ;;  %v3748_v37 = vld [vmem:[#allocation2 + $0x108] sm:$0xff] }
 0x17d   : > { %1195 = vrot.lane.b32.xlu1 %v506_v0, %s2853_s9  ;;  %v605_v21 = vld [vmem:[#allocation2 + $0x10a] sm:$0xff] }
 0x17e   : > { %1323 = vrot.lane.b32.xlu0 %v3696_v34, %s2854_s14 }
 0x17f   : > { %v1050_v19 = vpop.permute.xlu1 %1049  ;;  %v1178_v12 = vpop.permute.xlu0 %1177 }
 0x180   : > { %v1749_v0 = vsel %vm1741_vm4, %v1716_v51, %v1050_v19  ;;  %v1684_v19 = vsel %vm1675_vm2, %v1651_v14, %v3414_v61 }
 0x181   : > { %1197 = vrot.lane.b32.xlu1 %v507_v52, %s2853_s9  ;;  %v1782_v1 = vsel %vm1774_vm5, %v1749_v0, %v1178_v12  ;;  %v3760_v52 = vld [vmem:[#allocation2 + $0x110] sm:$0xff]  ;;  %v1717_v12 = vsel %vm1708_vm3, %v1684_v19, %v3540_v63 }
 0x182   : > { %1325 = vrot.lane.b32.xlu0 %v3703_v5, %s2854_s14 }
 0x183   : > { %v1558_v56 = vpop.permute.xlu1 %1557  ;;  %v1306_v31 = vpop.permute.xlu0 %1305 }
 0x184   : > { %v1879_v23 = vsel %vm1873_vm8, %v1846_v48, %v1558_v56  ;;  %v1815_v46 = vsel %vm1807_vm7, %v1782_v1, %v1306_v31  ;;  %v574_v31 = vld [vmem:[#allocation2 + $0x111] sm:$0xff] }
 0x185   : > { %943 = vrot.lane.b32.xlu1 %v3696_v34, %s2851_s8  ;;  %2669 = vmatmul.mubr.msk.f32.gmra.mrb[4].mxu0 %vm1922_vm9, %v1879_v23 }
 0x186   : > { %945 = vrot.lane.b32.xlu0 %v3703_v5, %s2851_s8 }
 0x187   : > { %v1304_v25 = vpop.permute.xlu1 %1303  ;;  %v1052_v13 = vpop.permute.xlu0 %1051 }
 0x188   : > { %v1814_v26 = vsel %vm1807_vm7, %v1781_v49, %v1304_v25  ;;  %v1750_v40 = vsel %vm1741_vm4, %v1717_v12, %v1052_v13  ;;  %v607_v12 = vld [vmem:[#allocation2 + $0x122] sm:$0xff] }
 0x189   : > { %1451 = vrot.lane.b32.xlu1 %v571_v11, %s2855_s29 }
 0x18a   : > { %1453 = vrot.lane.b32.xlu0 %v572_v6, %s2855_s29 }
 0x18b   : > { %v1432_v32 = vpop.permute.xlu1 %1431  ;;  %v1560_v47 = vpop.permute.xlu0 %1559 }
 0x18c   : > { %v1847_v15 = vsel %vm1840_vm6, %v1814_v26, %v1432_v32 }
 0x18d   : > { %1071 = vrot.lane.b32.xlu1 %v571_v11, %s2852_s23  ;;  %v1880_v8 = vsel %vm1873_vm8, %v1847_v15, %v1560_v47  ;;  %v1652_v11 = vsel %vm209_vm0, %v3281_v22, %v3255_v59  ;;  %v606_v22 = vld [vmem:[#allocation2 + $0x112] sm:$0xff]  ;;  %v3798_v15 = vld [vmem:[#allocation2 + $0x120] sm:$0xff] }
 0x18e   : > { %1073 = vrot.lane.b32.xlu0 %v572_v6, %s2852_s23  ;;  %2671 = vmatprep.mubr.msk.f32.mxu0 %vm1922_vm9, %v1880_v8  ;;  %v1685_v17 = vsel %vm1675_vm2, %v1652_v11, %v3428_v30  ;;  %v4439_v11 = vld [vmem:[#allocation11_spill] sm:$0xff] }
 0x18f   : > { %v1434_v50 = vpop.permute.xlu1 %1433  ;;  %v1180_v41 = vpop.permute.xlu0 %1179  ;;  %v1718_v25 = vsel %vm1708_vm3, %v1685_v17, %v3556_v10 }
 0x190   : > { %v1848_v44 = vsel %vm1840_vm6, %v1815_v46, %v1434_v50  ;;  %v1783_v53 = vsel %vm1774_vm5, %v1750_v40, %v1180_v41  ;;  %v1653_v50 = vsel %vm209_vm0, %v3275_v20, %v3247_v57  ;;  %v576_v46 = vld [vmem:[#allocation2 + $0x129] sm:$0xff] }
 0x191   : > { %1579 = vrot.lane.b32.xlu1 %v603_v29, %s2856_s30  ;;  %v1686_v41 = vsel %vm1675_vm2, %v1653_v50, %v3422_v35 }
 0x192   : > { %1581 = vrot.lane.b32.xlu0 %v604_v54, %s2856_s30  ;;  %v1719_v1 = vsel %vm1708_vm3, %v1686_v41, %v3548_v9 }
 0x193   : > { %v1054_v55 = vpop.permute.xlu1 %1053  ;;  %v1182_v28 = vpop.permute.xlu0 %1181 }
 0x194   : > { %v1751_v6 = vsel %vm1741_vm4, %v1718_v25, %v1054_v55  ;;  %v575_v55 = vld [vmem:[#allocation2 + $0x121] sm:$0xff]  ;;  %v4440_v25 = vld [vmem:[#allocation30_spill] sm:$0xff] }
 0x195   : > { %1199 = vrot.lane.b32.xlu1 %v603_v29, %s2853_s9  ;;  %v1784_v13 = vsel %vm1774_vm5, %v1751_v6, %v1182_v28  ;;  %v3805_v29 = vld [vmem:[#allocation2 + $0x128] sm:$0xff] }
 0x196   : > { %1327 = vrot.lane.b32.xlu0 %v3748_v37, %s2854_s14  ;;  %v4441_v6 = vld [vmem:[#allocation9_spill] sm:$0xff] }
 0x197   : > { %v1562_v42 = vpop.permute.xlu1 %1561  ;;  %v1310_v16 = vpop.permute.xlu0 %1309 }
 0x198   : > { %v1881_v18 = vsel %vm1873_vm8, %v1848_v44, %v1562_v42  ;;  %v1817_v30 = vsel %vm1807_vm7, %v1784_v13, %v1310_v16 }
 0x199   : > { %1201 = vrot.lane.b32.xlu1 %v604_v54, %s2853_s9  ;;  %2672 = vmatmul.mubr.msk.f32.gmra.mrb[6].mxu0 %vm1922_vm9, %v1881_v18  ;;  %v1654_v54 = vsel %vm209_vm0, %v3293_v33, %v4437_v39  ;;  %v578_v39 = vld [vmem:[#allocation2 + $0x141] sm:$0xff] }
 0x19a   : > { %1329 = vrot.lane.b32.xlu0 %v3760_v52, %s2854_s14  ;;  %v1687_v0 = vsel %vm1675_vm2, %v1654_v54, %v3436_v4 }
 0x19b   : > { %v1308_v60 = vpop.permute.xlu1 %1307  ;;  %v1056_v48 = vpop.permute.xlu0 %1055  ;;  %v1720_v57 = vsel %vm1708_vm3, %v1687_v0, %v3564_v45 }
 0x19c   : > { %v1816_v56 = vsel %vm1807_vm7, %v1783_v53, %v1308_v60  ;;  %v1752_v33 = vsel %vm1741_vm4, %v1719_v1, %v1056_v48  ;;  %v608_v48 = vld [vmem:[#allocation2 + $0x12a] sm:$0xff] }
 0x19d   : > { %947 = vrot.lane.b32.xlu1 %v3748_v37, %s2851_s8 }
 0x19e   : > { %949 = vrot.lane.b32.xlu0 %v3760_v52, %s2851_s8 }
 0x19f   : > { %v1436_v61 = vpop.permute.xlu1 %1435  ;;  %v1564_v43 = vpop.permute.xlu0 %1563 }
 0x1a0   : > { %v1849_v23 = vsel %vm1840_vm6, %v1816_v56, %v1436_v61  ;;  %v545_v56 = vld [vmem:[#allocation2 + $0x138] sm:$0xff] }
 0x1a1   : > { %1455 = vrot.lane.b32.xlu1 %v573_v62, %s2855_s29  ;;  %v1882_v63 = vsel %vm1873_vm8, %v1849_v23, %v1564_v43 }
 0x1a2   : > { %1457 = vrot.lane.b32.xlu0 %v574_v31, %s2855_s29  ;;  %2674 = vmatprep.mubr.msk.f32.mxu0 %vm1922_vm9, %v1882_v63  ;;  %v4438_v63 = vld [vmem:[#allocation6_spill] sm:$0xff] }
 0x1a3   : > { %v1438_v27 = vpop.permute.xlu1 %1437  ;;  %v1184_v7 = vpop.permute.xlu0 %1183 }
 0x1a4   : > { %v1850_v58 = vsel %vm1840_vm6, %v1817_v30, %v1438_v27  ;;  %v1785_v35 = vsel %vm1774_vm5, %v1752_v33, %v1184_v7  ;;  %v1655_v27 = vsel %vm209_vm0, %v4439_v11, %v4438_v63  ;;  %v4444_v30 = vld [vmem:[#allocation32_spill] sm:$0xff]  ;;  %v4450_v63 = vld [vmem:[#allocation34_spill] sm:$0xff] }
 0x1a5   : > { %1075 = vrot.lane.b32.xlu1 %v573_v62, %s2852_s23  ;;  %v1688_v7 = vsel %vm1675_vm2, %v1655_v27, %v4440_v25 }
 0x1a6   : > { %1077 = vrot.lane.b32.xlu0 %v574_v31, %s2852_s23  ;;  %v546_v31 = vld [vmem:[#allocation2 + $0x140] sm:$0xff] }
 0x1a7   : > { %v1058_v59 = vpop.permute.xlu1 %1057  ;;  %v1186_v49 = vpop.permute.xlu0 %1185 }
 0x1a8   : > { %v1753_v28 = vsel %vm1741_vm4, %v1720_v57, %v1058_v59 }
 0x1a9   : > { %1583 = vrot.lane.b32.xlu1 %v605_v21, %s2856_s30  ;;  %v1786_v9 = vsel %vm1774_vm5, %v1753_v28, %v1186_v49  ;;  %v609_v28 = vld [vmem:[#allocation2 + $0x13a] sm:$0xff] }
 0x1aa   : > { %1585 = vrot.lane.b32.xlu0 %v606_v22, %s2856_s30 }
 0x1ab   : > { %v1566_v10 = vpop.permute.xlu1 %1565  ;;  %v1314_v32 = vpop.permute.xlu0 %1313 }
 0x1ac   : > { %v1883_v26 = vsel %vm1873_vm8, %v1850_v58, %v1566_v10  ;;  %v1819_v18 = vsel %vm1807_vm7, %v1786_v9, %v1314_v32  ;;  %v547_v9 = vld [vmem:[#allocation2 + $0x150] sm:$0xff] }
 0x1ad   : > { %1203 = vrot.lane.b32.xlu1 %v605_v21, %s2853_s9  ;;  %2675 = vmatmul.mubr.msk.f32.gmra.mrb[8].mxu0 %vm1922_vm9, %v1883_v26  ;;  %v4442_v21 = vld [vmem:[#allocation16_spill] sm:$0xff]  ;;  %v577_v26 = vld [vmem:[#allocation2 + $0x139] sm:$0xff] }
 0x1ae   : > { %1331 = vrot.lane.b32.xlu0 %v3798_v15, %s2854_s14  ;;  %v1656_v59 = vsel %vm209_vm0, %v4442_v21, %v4441_v6 }
 0x1af   : > { %v1312_v47 = vpop.permute.xlu1 %1311  ;;  %v3802_v8 = vpop.permute.xlu0 %933  ;;  %v1689_v58 = vsel %vm1675_vm2, %v1656_v59, %v4444_v30  ;;  %v580_v59 = vld [vmem:[#allocation2 + $0x159] sm:$0xff] }
 0x1b0   : > { %v1818_v4 = vsel %vm1807_vm7, %v1785_v35, %v1312_v47  ;;  %v1722_v32 = vsel %vm1708_vm3, %v1689_v58, %v3802_v8  ;;  %v610_v35 = vld [vmem:[#allocation2 + $0x142] sm:$0xff] }
 0x1b1   : > { %1205 = vrot.lane.b32.xlu1 %v606_v22, %s2853_s9  ;;  %v4443_v22 = vld [vmem:[#allocation51_spill] sm:$0xff] }
 0x1b2   : > { %1333 = vrot.lane.b32.xlu0 %v3805_v29, %s2854_s14  ;;  %v1721_v13 = vsel %vm1708_vm3, %v1688_v7, %v4443_v22 }
 0x1b3   : > { %v1440_v36 = vpop.permute.xlu1 %1439  ;;  %v1442_v51 = vpop.permute.xlu0 %1441 }
 0x1b4   : > { %v1851_v45 = vsel %vm1840_vm6, %v1818_v4, %v1440_v36  ;;  %v1852_v14 = vsel %vm1840_vm6, %v1819_v18, %v1442_v51  ;;  %v548_v18 = vld [vmem:[#allocation2 + $0x158] sm:$0xff] }
 0x1b5   : > { %951 = vrot.lane.b32.xlu1 %v3798_v15, %s2851_s8 }
 0x1b6   : > { %953 = vrot.lane.b32.xlu0 %v3805_v29, %s2851_s8 }
 0x1b7   : > { %v1060_v20 = vpop.permute.xlu1 %1059  ;;  %v1062_v44 = vpop.permute.xlu0 %1061 }
 0x1b8   : > { %v1754_v10 = vsel %vm1741_vm4, %v1721_v13, %v1060_v20  ;;  %v1755_v50 = vsel %vm1741_vm4, %v1722_v32, %v1062_v44 }
 0x1b9   : > { %1459 = vrot.lane.b32.xlu1 %v575_v55, %s2855_s29 }
 0x1ba   : > { %1461 = vrot.lane.b32.xlu0 %v576_v46, %s2855_s29 }
 0x1bb   : > { %v1568_v42 = vpop.permute.xlu1 %1567  ;;  %v1570_v19 = vpop.permute.xlu0 %1569 }
 0x1bc   : > { %v1884_v16 = vsel %vm1873_vm8, %v1851_v45, %v1568_v42  ;;  %v1885_v60 = vsel %vm1873_vm8, %v1852_v14, %v1570_v19  ;;  %v4445_v14 = vld [vmem:[#allocation8_spill] sm:$0xff]  ;;  %v4446_v19 = vld [vmem:[#allocation14_spill] sm:$0xff] }
 0x1bd   : > { %1079 = vrot.lane.b32.xlu1 %v575_v55, %s2852_s23  ;;  %2677 = vmatprep.mubr.msk.f32.mxu0 %vm1922_vm9, %v1884_v16 }
 0x1be   : > { %1081 = vrot.lane.b32.xlu0 %v576_v46, %s2852_s23  ;;  %2678 = vmatmul.mubr.msk.f32.gmra.mrb[10].mxu0 %vm1922_vm9, %v1885_v60  ;;  %v1657_v60 = vsel %vm209_vm0, %v4446_v19, %v4445_v14 }
 0x1bf   : > { %v1188_v40 = vpop.permute.xlu1 %1187  ;;  %v1316_v53 = vpop.permute.xlu0 %1315 }
 0x1c0   : > { %v1787_v47 = vsel %vm1774_vm5, %v1754_v10, %v1188_v40  ;;  %v4447_v40 = vld [vmem:[#allocation31_spill] sm:$0xff] }
 0x1c1   : > { %1587 = vrot.lane.b32.xlu1 %v607_v12, %s2856_s30  ;;  %v1820_v41 = vsel %vm1807_vm7, %v1787_v47, %v1316_v53  ;;  %v4448_v53 = vld [vmem:[#allocation12_spill] sm:$0xff]  ;;  %v611_v47 = vld [vmem:[#allocation2 + $0x152] sm:$0xff] }
 0x1c2   : > { %1589 = vrot.lane.b32.xlu0 %v608_v48, %s2856_s30 }
 0x1c3   : > { %v1190_v62 = vpop.permute.xlu1 %1189  ;;  %v1318_v61 = vpop.permute.xlu0 %1317 }
 0x1c4   : > { %v1788_v54 = vsel %vm1774_vm5, %v1755_v50, %v1190_v62  ;;  %v4449_v62 = vld [vmem:[#allocation50_spill] sm:$0xff] }
 0x1c5   : > { %1207 = vrot.lane.b32.xlu1 %v607_v12, %s2853_s9  ;;  %v1821_v55 = vsel %vm1807_vm7, %v1788_v54, %v1318_v61  ;;  %v612_v50 = vld [vmem:[#allocation2 + $0x15a] sm:$0xff] }
 0x1c6   : > { %1335 = vrot.lane.b32.xlu0 %v545_v56, %s2854_s14 }
 0x1c7   : > { %v936_v23 = vpop.permute.xlu1 %935  ;;  %v938_v43 = vpop.permute.xlu0 %937 }
 0x1c9   : > { %1209 = vrot.lane.b32.xlu1 %v608_v48, %s2853_s9  ;;  %v1690_v48 = vsel %vm1675_vm2, %v1657_v60, %v4447_v40 }
 0x1ca   : > { %1337 = vrot.lane.b32.xlu0 %v546_v31, %s2854_s14  ;;  %v1723_v61 = vsel %vm1708_vm3, %v1690_v48, %v936_v23 }
 0x1cb   : > { %v1444_v17 = vpop.permute.xlu1 %1443  ;;  %v1446_v49 = vpop.permute.xlu0 %1445 }
 0x1cc   : > { %v1853_v0 = vsel %vm1840_vm6, %v1820_v41, %v1444_v17  ;;  %v1854_v57 = vsel %vm1840_vm6, %v1821_v55, %v1446_v49  ;;  %v579_v17 = vld [vmem:[#allocation2 + $0x151] sm:$0xff] }
 0x1cd   : > { %955 = vrot.lane.b32.xlu1 %v545_v56, %s2851_s8  ;;  %v1658_v56 = vsel %vm209_vm0, %v4449_v62, %v4448_v53 }
 0x1ce   : > { %957 = vrot.lane.b32.xlu0 %v546_v31, %s2851_s8  ;;  %v1691_v11 = vsel %vm1675_vm2, %v1658_v56, %v4450_v63 }
 0x1cf   : > { %v1064_v36 = vpop.permute.xlu1 %1063  ;;  %v1724_v25 = vsel %vm1708_vm3, %v1691_v11, %v938_v43  ;;  %v613_v11 = vld [vmem:[#allocation2 + $0x16a] sm:$0xff] }
 0x1d0   : > { %v1066_v51 = vpop.permute.xlu0 %1065  ;;  %v1756_v27 = vsel %vm1741_vm4, %v1723_v61, %v1064_v36 }
 0x1d1   : > { %1463 = vrot.lane.b32.xlu1 %v577_v26, %s2855_s29  ;;  %v1757_v21 = vsel %vm1741_vm4, %v1724_v25, %v1066_v51  ;;  %v549_v51 = vld [vmem:[#allocation2 + $0x168] sm:$0xff] }
 0x1d2   : > { %1465 = vrot.lane.b32.xlu0 %v578_v39, %s2855_s29 }
 0x1d3   : > { %v1572_v8 = vpop.permute.xlu1 %1571 }
 0x1d4   : > { %v1886_v1 = vsel %vm1873_vm8, %v1853_v0, %v1572_v8  ;;  %v1574_v20 = vpop.permute.xlu0 %1573  ;;  %v550_v8 = vld [vmem:[#allocation2 + $0x170] sm:$0xff] }
 0x1d5   : > { %1083 = vrot.lane.b32.xlu1 %v577_v26, %s2852_s23  ;;  %2680 = vmatprep.mubr.msk.f32.mxu0 %vm1922_vm9, %v1886_v1  ;;  %v1887_v33 = vsel %vm1873_vm8, %v1854_v57, %v1574_v20  ;;  %v4451_v1 = vld [vmem:[#allocation10_spill] sm:$0xff] }
 0x1d6   : > { %1085 = vrot.lane.b32.xlu0 %v578_v39, %s2852_s23  ;;  %2681 = vmatmul.mubr.msk.f32.gmra.mrb[12].mxu0 %vm1922_vm9, %v1887_v33  ;;  %v1659_v57 = vsel %vm209_vm0, %v3586_v24, %v4451_v1  ;;  %v4452_v33 = vld [vmem:[#allocation33_spill] sm:$0xff] }
 0x1d7   : > { %v1192_v46 = vpop.permute.xlu1 %1191 }
 0x1d8   : > { %v1320_v44 = vpop.permute.xlu0 %1319  ;;  %v1789_v7 = vsel %vm1774_vm5, %v1756_v27, %v1192_v46  ;;  %v4453_v46 = vld [vmem:[#allocation15_spill] sm:$0xff] }
 0x1d9   : > { %1591 = vrot.lane.b32.xlu1 %v609_v28, %s2856_s30  ;;  %v1822_v13 = vsel %vm1807_vm7, %v1789_v7, %v1320_v44 }
 0x1da   : > { %1593 = vrot.lane.b32.xlu0 %v610_v35, %s2856_s30 }
 0x1db   : > { %v1194_v4 = vpop.permute.xlu1 %1193 }
 0x1dc   : > { %v1322_v45 = vpop.permute.xlu0 %1321  ;;  %v1790_v23 = vsel %vm1774_vm5, %v1757_v21, %v1194_v4 }
 0x1dd   : > { %1211 = vrot.lane.b32.xlu1 %v609_v28, %s2853_s9  ;;  %v1823_v30 = vsel %vm1807_vm7, %v1790_v23, %v1322_v45  ;;  %v1692_v28 = vsel %vm1675_vm2, %v1659_v57, %v4452_v33  ;;  %v552_v23 = vld [vmem:[#allocation2 + $0x188] sm:$0xff] }
 0x1de   : > { %1339 = vrot.lane.b32.xlu0 %v547_v9, %s2854_s14 }
 0x1df   : > { %v940_v42 = vpop.permute.xlu1 %939 }
 0x1e0   : > { %v942_v16 = vpop.permute.xlu0 %941  ;;  %v1725_v44 = vsel %vm1708_vm3, %v1692_v28, %v940_v42 }
 0x1e1   : > { %1213 = vrot.lane.b32.xlu1 %v610_v35, %s2853_s9  ;;  %v1660_v35 = vsel %vm209_vm0, %v3595_v38, %v4453_v46 }
 0x1e2   : > { %1341 = vrot.lane.b32.xlu0 %v548_v18, %s2854_s14 }
 0x1e3   : > { %v1448_v12 = vpop.permute.xlu1 %1447 }
 0x1e4   : > { %v1450_v31 = vpop.permute.xlu0 %1449  ;;  %v1855_v49 = vsel %vm1840_vm6, %v1822_v13, %v1448_v12  ;;  %v582_v12 = vld [vmem:[#allocation2 + $0x171] sm:$0xff] }
 0x1e5   : > { %959 = vrot.lane.b32.xlu1 %v547_v9, %s2851_s8  ;;  %v1856_v10 = vsel %vm1840_vm6, %v1823_v30, %v1450_v31  ;;  %v4454_v9 = vld [vmem:[#allocation36_spill] sm:$0xff]  ;;  %v4455_v13 = vld [vmem:[#allocation13_spill] sm:$0xff]  ;;  %v4456_v30 = vld [vmem:[#allocation35_spill] sm:$0xff] }
 0x1e6   : > { %961 = vrot.lane.b32.xlu0 %v548_v18, %s2851_s8  ;;  %v1693_v45 = vsel %vm1675_vm2, %v1660_v35, %v4454_v9  ;;  %v581_v18 = vld [vmem:[#allocation2 + $0x169] sm:$0xff] }
 0x1e7   : > { %v1068_v6 = vpop.permute.xlu1 %1067  ;;  %v1726_v14 = vsel %vm1708_vm3, %v1693_v45, %v942_v16  ;;  %v616_v45 = vld [vmem:[#allocation2 + $0x18a] sm:$0xff] }
 0x1e8   : > { %v1070_v22 = vpop.permute.xlu0 %1069  ;;  %v1758_v24 = vsel %vm1741_vm4, %v1725_v44, %v1068_v6  ;;  %v551_v6 = vld [vmem:[#allocation2 + $0x180] sm:$0xff] }
 0x1e9   : > { %1467 = vrot.lane.b32.xlu1 %v579_v17, %s2855_s29  ;;  %v1759_v38 = vsel %vm1741_vm4, %v1726_v14, %v1070_v22  ;;  %v553_v14 = vld [vmem:[#allocation2 + $0x198] sm:$0xff] }
 0x1ea   : > { %1469 = vrot.lane.b32.xlu0 %v580_v59, %s2855_s29 }
 0x1eb   : > { %v1576_v43 = vpop.permute.xlu1 %1575 }
 0x1ec   : > { %v1888_v58 = vsel %vm1873_vm8, %v1855_v49, %v1576_v43  ;;  %v1578_v26 = vpop.permute.xlu0 %1577  ;;  %v1661_v49 = vsel %vm209_vm0, %v3638_v3, %v4455_v13 }
 0x1ed   : > { %1087 = vrot.lane.b32.xlu1 %v579_v17, %s2852_s23  ;;  %2683 = vmatprep.mubr.msk.f32.mxu0 %vm1922_vm9, %v1888_v58  ;;  %v1889_v32 = vsel %vm1873_vm8, %v1856_v10, %v1578_v26  ;;  %v614_v17 = vld [vmem:[#allocation2 + $0x172] sm:$0xff]  ;;  %v1694_v58 = vsel %vm1675_vm2, %v1661_v49, %v4456_v30 }
 0x1ee   : > { %1089 = vrot.lane.b32.xlu0 %v580_v59, %s2852_s23  ;;  %2684 = vmatmul.mubr.msk.f32.gmra.mrb[14].mxu0 %vm1922_vm9, %v1889_v32  ;;  %v4457_v10 = vld [vmem:[#allocation18_spill] sm:$0xff] }
 0x1ef   : > { %v1196_v36 = vpop.permute.xlu1 %1195  ;;  %v1662_v26 = vsel %vm209_vm0, %v3653_v2, %v4457_v10  ;;  %v618_v10 = vld [vmem:[#allocation2 + $0x1a2] sm:$0xff] }
 0x1f0   : > { %v1324_v39 = vpop.permute.xlu0 %1323  ;;  %v1791_v19 = vsel %vm1774_vm5, %v1758_v24, %v1196_v36  ;;  %v4458_v36 = vld [vmem:[#allocation38_spill] sm:$0xff] }
 0x1f1   : > { %1595 = vrot.lane.b32.xlu1 %v611_v47, %s2856_s30  ;;  %v1824_v48 = vsel %vm1807_vm7, %v1791_v19, %v1324_v39  ;;  %v583_v39 = vld [vmem:[#allocation2 + $0x181] sm:$0xff] }
 0x1f2   : > { %1597 = vrot.lane.b32.xlu0 %v612_v50, %s2856_s30 }
 0x1f3   : > { %v1198_v54 = vpop.permute.xlu1 %1197 }
 0x1f4   : > { %v1326_v41 = vpop.permute.xlu0 %1325  ;;  %v1792_v42 = vsel %vm1774_vm5, %v1759_v38, %v1198_v54  ;;  %v585_v38 = vld [vmem:[#allocation2 + $0x199] sm:$0xff] }
 0x1f5   : > { %1215 = vrot.lane.b32.xlu1 %v611_v47, %s2853_s9  ;;  %v1825_v62 = vsel %vm1807_vm7, %v1792_v42, %v1326_v41  ;;  %v554_v42 = vld [vmem:[#allocation2 + $0x1a0] sm:$0xff] }
 0x1f6   : > { %1343 = vrot.lane.b32.xlu0 %v549_v51, %s2854_s14 }
 0x1f7   : > { %v944_v0 = vpop.permute.xlu1 %943 }
 0x1f8   : > { %v946_v55 = vpop.permute.xlu0 %945  ;;  %v1727_v32 = vsel %vm1708_vm3, %v1694_v58, %v944_v0 }
 0x1f9   : > { %1217 = vrot.lane.b32.xlu1 %v612_v50, %s2853_s9  ;;  %v1695_v50 = vsel %vm1675_vm2, %v1662_v26, %v4458_v36 }
 0x1fa   : > { %1345 = vrot.lane.b32.xlu0 %v550_v8, %s2854_s14  ;;  %v1728_v54 = vsel %vm1708_vm3, %v1695_v50, %v946_v55 }
 0x1fb   : > { %v1452_v20 = vpop.permute.xlu1 %1451 }
 0x1fc   : > { %v1454_v4 = vpop.permute.xlu0 %1453  ;;  %v1857_v53 = vsel %vm1840_vm6, %v1824_v48, %v1452_v20 }
 0x1fd   : > { %963 = vrot.lane.b32.xlu1 %v549_v51, %s2851_s8  ;;  %v1858_v61 = vsel %vm1840_vm6, %v1825_v62, %v1454_v4  ;;  %v615_v4 = vld [vmem:[#allocation2 + $0x182] sm:$0xff] }
 0x1fe   : > { %965 = vrot.lane.b32.xlu0 %v550_v8, %s2851_s8  ;;  %v584_v8 = vld [vmem:[#allocation2 + $0x189] sm:$0xff] }
 0x1ff   : > { %v1072_v60 = vpop.permute.xlu1 %1071 }
 0x200   : > { %v1074_v40 = vpop.permute.xlu0 %1073  ;;  %v1760_v3 = vsel %vm1741_vm4, %v1727_v32, %v1072_v60 }
 0x201   : > { %1471 = vrot.lane.b32.xlu1 %v581_v18, %s2855_s29  ;;  %v1761_v2 = vsel %vm1741_vm4, %v1728_v54, %v1074_v40  ;;  %v4459_v40 = vld [vmem:[#allocation17_spill] sm:$0xff] }
 0x202   : > { %1473 = vrot.lane.b32.xlu0 %v582_v12, %s2855_s29  ;;  %v1663_v48 = vsel %vm209_vm0, %v3696_v34, %v4459_v40 }
 0x203   : > { %v1580_v16 = vpop.permute.xlu1 %1579 }
 0x204   : > { %v1890_v56 = vsel %vm1873_vm8, %v1857_v53, %v1580_v16  ;;  %v1582_v31 = vpop.permute.xlu0 %1581  ;;  %v4460_v16 = vld [vmem:[#allocation37_spill] sm:$0xff] }
 0x205   : > { %1091 = vrot.lane.b32.xlu1 %v581_v18, %s2852_s23  ;;  %2686 = vmatprep.mubr.msk.f32.mxu1 %vm1922_vm9, %v1890_v56  ;;  %v1891_v63 = vsel %vm1873_vm8, %v1858_v61, %v1582_v31  ;;  %v1696_v62 = vsel %vm1675_vm2, %v1663_v48, %v4460_v16  ;;  %v617_v56 = vld [vmem:[#allocation2 + $0x19a] sm:$0xff]  ;;  %v4461_v61 = vld [vmem:[#allocation20_spill] sm:$0xff] }
 0x206   : > { %1093 = vrot.lane.b32.xlu0 %v582_v12, %s2852_s23  ;;  %2687 = vmatmul.mubr.msk.f32.vlgmr.msra.gmra.mrb[0].mxu1 %vm1922_vm9, %v1891_v63  ;;  %v1664_v31 = vsel %vm209_vm0, %v3703_v5, %v4461_v61 }
 0x207   : > { %v1200_v27 = vpop.permute.xlu1 %1199 }
 0x208   : > { %v1328_v25 = vpop.permute.xlu0 %1327  ;;  %v1793_v51 = vsel %vm1774_vm5, %v1760_v3, %v1200_v27  ;;  %v4462_v27 = vld [vmem:[#allocation40_spill] sm:$0xff] }
 0x209   : > { %1599 = vrot.lane.b32.xlu1 %v613_v11, %s2856_s30  ;;  %v1826_v57 = vsel %vm1807_vm7, %v1793_v51, %v1328_v25  ;;  %v1697_v34 = vsel %vm1675_vm2, %v1664_v31, %v4462_v27  ;;  %v4017_v25 = vld [vmem:[%s4382_s2] ss:$0 sm:$0xff] }
 0x20a   : > { %1601 = vrot.lane.b32.xlu0 %v614_v17, %s2856_s30 }
 0x20b   : > { %v1202_v7 = vpop.permute.xlu1 %1201 }
 0x20c   : > { %v1330_v21 = vpop.permute.xlu0 %1329  ;;  %v1794_v0 = vsel %vm1774_vm5, %v1761_v2, %v1202_v7  ;;  %v586_v7 = vld [vmem:[#allocation2 + $0x1a1] sm:$0xff] }
 0x20d   : > { %1219 = vrot.lane.b32.xlu1 %v613_v11, %s2853_s9  ;;  %v1827_v33 = vsel %vm1807_vm7, %v1794_v0, %v1330_v21 }
 0x20e   : > { %1347 = vrot.lane.b32.xlu0 %v551_v6, %s2854_s14 }
 0x20f   : > { %v948_v59 = vpop.permute.xlu1 %947 }
 0x210   : > { %v3957_v22 = vpop.permute.xlu0 %949  ;;  %v1729_v63 = vsel %vm1708_vm3, %v1696_v62, %v948_v59 }
 0x211   : > { %1221 = vrot.lane.b32.xlu1 %v614_v17, %s2853_s9 }
 0x212   : > { %1349 = vrot.lane.b32.xlu0 %v552_v23, %s2854_s14 }
 0x213   : > { %v1456_v43 = vpop.permute.xlu1 %1455 }
 0x214   : > { %v1458_v47 = vpop.permute.xlu0 %1457  ;;  %v1859_v20 = vsel %vm1840_vm6, %v1826_v57, %v1456_v43 }
 0x215   : > { %967 = vrot.lane.b32.xlu1 %v551_v6, %s2851_s8  ;;  %v1860_v46 = vsel %vm1840_vm6, %v1827_v33, %v1458_v47  ;;  %v1730_v6 = vsel %vm1708_vm3, %v1697_v34, %v3957_v22 }
 0x216   : > { %969 = vrot.lane.b32.xlu0 %v552_v23, %s2851_s8 }
 0x217   : > { %v1076_v41 = vpop.permute.xlu1 %1075 }
 0x218   : > { %v1078_v1 = vpop.permute.xlu0 %1077  ;;  %v1762_v17 = vsel %vm1741_vm4, %v1729_v63, %v1076_v41 }
 0x219   : > { %1475 = vrot.lane.b32.xlu1 %v583_v39, %s2855_s29  ;;  %v1763_v59 = vsel %vm1741_vm4, %v1730_v6, %v1078_v1 }
 0x21a   : > { %1477 = vrot.lane.b32.xlu0 %v584_v8, %s2855_s29 }
 0x21b   : > { %v1584_v55 = vpop.permute.xlu1 %1583 }
 0x21c   : > { %v1892_v28 = vsel %vm1873_vm8, %v1859_v20, %v1584_v55  ;;  %v1586_v35 = vpop.permute.xlu0 %1585 }
 0x21d   : > { %1095 = vrot.lane.b32.xlu1 %v583_v39, %s2852_s23  ;;  %2689 = vmatprep.mubr.msk.f32.mxu1 %vm1922_vm9, %v1892_v28  ;;  %v1893_v44 = vsel %vm1873_vm8, %v1860_v46, %v1586_v35 }
 0x21e   : > { %1097 = vrot.lane.b32.xlu0 %v584_v8, %s2852_s23  ;;  %2690 = vmatmul.mubr.msk.f32.gmra.mrb[2].mxu1 %vm1922_vm9, %v1893_v44  ;;  %v4463_v44 = vld [vmem:[#allocation19_spill] sm:$0xff] }
 0x21f   : > { %v1204_v9 = vpop.permute.xlu1 %1203 }
 0x220   : > { %v1332_v24 = vpop.permute.xlu0 %1331  ;;  %v1795_v5 = vsel %vm1774_vm5, %v1762_v17, %v1204_v9 }
 0x221   : > { %1603 = vrot.lane.b32.xlu1 %v615_v4, %s2856_s30  ;;  %v1828_v30 = vsel %vm1807_vm7, %v1795_v5, %v1332_v24 }
 0x222   : > { %1605 = vrot.lane.b32.xlu0 %v616_v45, %s2856_s30 }
 0x223   : > { %v1206_v18 = vpop.permute.xlu1 %1205 }
 0x224   : > { %v1334_v19 = vpop.permute.xlu0 %1333  ;;  %v1796_v13 = vsel %vm1774_vm5, %v1763_v59, %v1206_v18 }
 0x225   : > { %1223 = vrot.lane.b32.xlu1 %v615_v4, %s2853_s9  ;;  %v1829_v50 = vsel %vm1807_vm7, %v1796_v13, %v1334_v19  ;;  %v1665_v4 = vsel %vm209_vm0, %v3748_v37, %v4463_v44 }
 0x226   : > { %1351 = vrot.lane.b32.xlu0 %v553_v14, %s2854_s14  ;;  %v4465_v14 = vld [vmem:[#allocation22_spill] sm:$0xff] }
 0x227   : > { %v3995_v60 = vpop.permute.xlu1 %951  ;;  %v1666_v19 = vsel %vm209_vm0, %v3760_v52, %v4465_v14 }
 0x228   : > { %v3997_v12 = vpop.permute.xlu0 %953 }
 0x229   : > { %1225 = vrot.lane.b32.xlu1 %v616_v45, %s2853_s9  ;;  %v4464_v45 = vld [vmem:[#allocation39_spill] sm:$0xff]  ;;  %s2598_s9 = sshll.u32 %s2904_s19, 5  ;;  %s2857_s19 = smov [#allocation3]  }
 0x22a   : > { %1479 = vrot.lane.b32.xlu0 %v585_v38, %s2855_s29  ;;  %v1698_v24 = vsel %vm1675_vm2, %v1665_v4, %v4464_v45  ;;  %v4470_v45 = vld [vmem:[#allocation44_spill] sm:$0xff] }
 0x22b   : > { %v1460_v53 = vpop.permute.xlu1 %1459  ;;  %v1731_v38 = vsel %vm1708_vm3, %v1698_v24, %v3995_v60 }
 0x22c   : > { %v1462_v11 = vpop.permute.xlu0 %1461  ;;  %v1861_v26 = vsel %vm1840_vm6, %v1828_v30, %v1460_v53  ;;  %v4466_v53 = vld [vmem:[#allocation42_spill] sm:$0xff] }
 0x22d   : > { %1353 = vrot.lane.b32.xlu1 %v554_v42, %s2854_s14  ;;  %v1862_v51 = vsel %vm1840_vm6, %v1829_v50, %v1462_v11  ;;  %v1699_v37 = vsel %vm1675_vm2, %v1666_v19, %v4466_v53  ;;  %s4338_s14 = scalar_lea.hbm %s4384_s4, %s2598_s9 }
 0x22e   : > { %1607 = vrot.lane.b32.xlu0 %v617_v56, %s2856_s30  ;;  %v1732_v56 = vsel %vm1708_vm3, %v1699_v37, %v3997_v12 }
 0x22f   : > { %v1080_v21 = vpop.permute.xlu1 %1079 }
 0x230   : > { %v2664_v23 = vpop.f32.mrb[0].mxu0  ;;  %v1082_v49 = vpop.permute.xlu0 %1081  ;;  %v1764_v16 = vsel %vm1741_vm4, %v1731_v38, %v1080_v21 }
 0x231   : > { %v2091_v22 = vadd.f32 %v2664_v23, %v4017_v25  ;;  %v2085_v43 = vpop.f32.mrb[1].mxu0  ;;  %1481 = vrot.lane.b32.xlu1 %v586_v7, %s2855_s29  ;;  %v1765_v60 = vsel %vm1741_vm4, %v1732_v56, %v1082_v49  ;;  %s2788_s29 = sshll.u32 %s2857_s19, 4  ;;  %s2789_s29 = int_to_ptr.vmem [resolvable:$false] %s2788_s29 }
 0x232   : > { %v2086_v58 = vadd.f32 %v4017_v25, %v2085_v43  ;;  %p2791_p0 = scmp.lt.s32.totalorder %s4340_s11, %s2789_s29 }
 0x233   : > { %v2245_v32 = vsel %vm209_vm0, %v2091_v22, 0.0  ;;  %v2316_v47 = vmul.f32 %v2091_v22, %v2091_v22  ;;  %2418 = vst.msk [vmem:[%s4029_s7 + $0x8] sm:$0xff] %vm209_vm0, %v2091_v22  ;;  %v1588_v36 = vpop.permute.xlu1 %1587 }
 0x234   : > { %v2244_v3 = vsel %vm209_vm0, %v2086_v58, 0.0  ;;  %v2315_v39 = vmul.f32 %v2086_v58, %v2086_v58  ;;  %2417 = vst.msk [vmem:[%s4029_s7] sm:$0xff] %vm209_vm0, %v2086_v58  ;;  %v1894_v54 = vsel %vm1873_vm8, %v1861_v26, %v1588_v36  ;;  %v1590_v8 = vpop.permute.xlu0 %1589 }
 0x235   : > { %v2348_v41 = vsel %vm209_vm0, %v2316_v47, 0.0  ;;  %v2246_v2 = vadd.f32 %v2245_v32, %v2244_v3  ;;  %1609 = vrot.lane.b32.xlu1 %v618_v10, %s2856_s30  ;;  %2692 = vmatprep.mubr.msk.f32.mxu1 %vm1922_vm9, %v1894_v54  ;;  %v1895_v1 = vsel %vm1873_vm8, %v1862_v51, %v1590_v8  ;;  %s2790_s30 = scalar_lea.vmem %s2789_s29, 64 }
 0x236   : > { %v2347_v0 = vsel %vm209_vm0, %v2315_v39, 0.0  ;;  %2693 = vmatmul.mubr.msk.f32.gmra.mrb[4].mxu1 %vm1922_vm9, %v1895_v1  ;;  %v4468_v1 = vld [vmem:[#allocation41_spill] sm:$0xff]  ;;  %p2792_p1 = scmp.lt.s32.totalorder %s2790_s30, %s2784_s22 }
 0x237   : > { %v2349_v57 = vadd.f32 %v2348_v41, %v2347_v0  ;;  %v1208_v20 = vpop.permute.xlu1 %1207 }
 0x238   : > { %v1336_v55 = vpop.permute.xlu0 %1335  ;;  %v1797_v52 = vsel %vm1774_vm5, %v1764_v16, %v1208_v20  ;;  %p2793_p2 = por %p2792_p1, %p2791_p0 }
 0x239   : > { %v1830_v7 = vsel %vm1807_vm7, %v1797_v52, %v1336_v55 }
 0x23a   : > { %p2794_p3 = pnand %p2793_p2, %p2787_p13 }
 0x23b   : > { %v1210_v33 = vpop.permute.xlu1 %1209 }
 0x23c   : > { %v1338_v28 = vpop.permute.xlu0 %1337  ;;  %v1798_v27 = vsel %vm1774_vm5, %v1765_v60, %v1210_v33 }
 0x23d   : > { %v1831_v13 = vsel %vm1807_vm7, %v1798_v27, %v1338_v28  ;;  %v4469_v28 = vld [vmem:[#allocation24_spill] sm:$0xff] }
 0x23e   : > { %v1668_v44 = vsel %vm209_vm0, %v3805_v29, %v4469_v28 }
 0x23f   : > { %v956_v46 = vpop.permute.xlu1 %955  ;;  %v1701_v24 = vsel %vm1675_vm2, %v1668_v44, %v4470_v45 }
 0x240   : > { %v4052_v35 = vpop.permute.xlu0 %957 }
 0x241   : > { %v1734_v38 = vsel %vm1708_vm3, %v1701_v24, %v4052_v35 }
 0x243   : > { %v1464_v9 = vpop.permute.xlu1 %1463 }
 0x244   : > { %v2667_v18 = vpop.f32.mrb[2].mxu0  ;;  %v1466_v40 = vpop.permute.xlu0 %1465  ;;  %v1863_v5 = vsel %vm1840_vm6, %v1830_v7, %v1464_v9 }
 0x245   : > { %v2101_v42 = vadd.f32 %v2667_v18, %v4017_v25  ;;  %v2095_v48 = vpop.f32.mrb[3].mxu0  ;;  %v1864_v43 = vsel %vm1840_vm6, %v1831_v13, %v1466_v40 }
 0x246   : > { %v2096_v62 = vadd.f32 %v4017_v25, %v2095_v48 }
 0x247   : > { %2420 = vst.msk [vmem:[%s4029_s7 + $0x18] sm:$0xff] %vm209_vm0, %v2101_v42  ;;  %v1084_v61 = vpop.permute.xlu1 %1083  ;;  %v2318_v31 = vmul.f32 %v2101_v42, %v2101_v42  ;;  %v2249_v12 = vsel %vm209_vm0, %v2101_v42, 0.0 }
 0x248   : > { %v2247_v63 = vsel %vm209_vm0, %v2096_v62, 0.0  ;;  %v2317_v11 = vmul.f32 %v2096_v62, %v2096_v62  ;;  %2419 = vst.msk [vmem:[%s4029_s7 + $0x10] sm:$0xff] %vm209_vm0, %v2096_v62  ;;  %v1086_v17 = vpop.permute.xlu0 %1085 }
 0x249   : > { %v2248_v34 = vadd.f32 %v2247_v63, %v2246_v2  ;;  %v2352_v22 = vsel %vm209_vm0, %v2318_v31, 0.0  ;;  %v4467_v2 = vld [vmem:[#allocation21_spill] sm:$0xff] }
 0x24a   : > { %v2350_v6 = vsel %vm209_vm0, %v2317_v11, 0.0  ;;  %v1667_v8 = vsel %vm209_vm0, %v3798_v15, %v4467_v2 }
 0x24b   : > { %v2351_v21 = vadd.f32 %v2350_v6, %v2349_v57  ;;  %v1592_v59 = vpop.permute.xlu1 %1591  ;;  %v2250_v23 = vadd.f32 %v2249_v12, %v2248_v34  ;;  %v1700_v57 = vsel %vm1675_vm2, %v1667_v8, %v4468_v1  ;;  %v4473_v8 = vld [vmem:[#allocation26_spill] sm:$0xff] }
 0x24c   : > { %v1896_v49 = vsel %vm1873_vm8, %v1863_v5, %v1592_v59  ;;  %v1594_v30 = vpop.permute.xlu0 %1593  ;;  %v1733_v4 = vsel %vm1708_vm3, %v1700_v57, %v956_v46  ;;  %v1767_v46 = vsel %vm1741_vm4, %v1734_v38, %v1086_v17 }
 0x24d   : > { %2695 = vmatprep.mubr.msk.f32.mxu1 %vm1922_vm9, %v1896_v49  ;;  %v2353_v58 = vadd.f32 %v2352_v22, %v2351_v21  ;;  %v1897_v10 = vsel %vm1873_vm8, %v1864_v43, %v1594_v30  ;;  %v1766_v18 = vsel %vm1741_vm4, %v1733_v4, %v1084_v61 }
 0x24e   : > { %2696 = vmatmul.mubr.msk.f32.gmra.mrb[6].mxu1 %vm1922_vm9, %v1897_v10 }
 0x24f   : > { %v1212_v26 = vpop.permute.xlu1 %1211 }
 0x250   : > { %v1340_v32 = vpop.permute.xlu0 %1339  ;;  %v1799_v42 = vsel %vm1774_vm5, %v1766_v18, %v1212_v26 }
 0x251   : > { %v1832_v56 = vsel %vm1807_vm7, %v1799_v42, %v1340_v32  ;;  %v4471_v32 = vld [vmem:[#allocation23_spill] sm:$0xff] }
 0x253   : > { %v1214_v47 = vpop.permute.xlu1 %1213 }
 0x254   : > { %v1342_v36 = vpop.permute.xlu0 %1341  ;;  %v1800_v37 = vsel %vm1774_vm5, %v1767_v46, %v1214_v47 }
 0x255   : > { %v1833_v35 = vsel %vm1807_vm7, %v1800_v37, %v1342_v36 }
 0x257   : > { %v4090_v50 = vpop.permute.xlu1 %959 }
 0x258   : > { %v2670_v3 = vpop.f32.mrb[4].mxu0  ;;  %v4093_v54 = vpop.permute.xlu0 %961 }
 0x259   : > { %v2111_v39 = vadd.f32 %v2670_v3, %v4017_v25  ;;  %v2105_v51 = vpop.f32.mrb[5].mxu0 }
 0x25a   : > { %v2106_v41 = vadd.f32 %v4017_v25, %v2105_v51  ;;  %v4472_v51 = vld [vmem:[#allocation43_spill] sm:$0xff] }
 0x25b   : > { %2422 = vst.msk [vmem:[%s4029_s7 + $0x28] sm:$0xff] %vm209_vm0, %v2111_v39  ;;  %v1468_v0 = vpop.permute.xlu1 %1467  ;;  %v2320_v20 = vmul.f32 %v2111_v39, %v2111_v39  ;;  %v2253_v14 = vsel %vm209_vm0, %v2111_v39, 0.0 }
 0x25c   : > { %v2251_v55 = vsel %vm209_vm0, %v2106_v41, 0.0  ;;  %v2319_v33 = vmul.f32 %v2106_v41, %v2106_v41  ;;  %2421 = vst.msk [vmem:[%s4029_s7 + $0x20] sm:$0xff] %vm209_vm0, %v2106_v41  ;;  %v1470_v15 = vpop.permute.xlu0 %1469  ;;  %v1865_v52 = vsel %vm1840_vm6, %v1832_v56, %v1468_v0 }
 0x25d   : > { %v2252_v9 = vadd.f32 %v2251_v55, %v2250_v23  ;;  %v2356_v53 = vsel %vm209_vm0, %v2320_v20, 0.0  ;;  %v1866_v31 = vsel %vm1840_vm6, %v1833_v35, %v1470_v15  ;;  %v356_v23 = vld [vmem:[#allocation2 + $0x138] sm:$0xff] }
 0x25e   : > { %v2354_v19 = vsel %vm209_vm0, %v2319_v33, 0.0  ;;  %v1669_v47 = vsel %vm209_vm0, %v356_v23, %v4471_v32  ;;  %v4474_v55 = vld [vmem:[#allocation46_spill] sm:$0xff]  ;;  %v4478_v32 = vld [vmem:[#allocation48_spill] sm:$0xff] }
 0x25f   : > { %v2355_v40 = vadd.f32 %v2354_v19, %v2353_v58  ;;  %v1088_v29 = vpop.permute.xlu1 %1087  ;;  %v2254_v48 = vadd.f32 %v2253_v14, %v2252_v9  ;;  %v357_v58 = vld [vmem:[#allocation2 + $0x140] sm:$0xff]  ;;  %v1702_v41 = vsel %vm1675_vm2, %v1669_v47, %v4472_v51 }
 0x260   : > { %v1090_v16 = vpop.permute.xlu0 %1089  ;;  %v1670_v0 = vsel %vm209_vm0, %v357_v58, %v4473_v8  ;;  %v1735_v1 = vsel %vm1708_vm3, %v1702_v41, %v4090_v50 }
 0x261   : > { %v2357_v62 = vadd.f32 %v2356_v53, %v2355_v40  ;;  %v1703_v33 = vsel %vm1675_vm2, %v1670_v0, %v4474_v55  ;;  %v1768_v28 = vsel %vm1741_vm4, %v1735_v1, %v1088_v29 }
 0x262   : > { %v1736_v44 = vsel %vm1708_vm3, %v1703_v33, %v4093_v54 }
 0x263   : > { %v1596_v61 = vpop.permute.xlu1 %1595  ;;  %v1769_v15 = vsel %vm1741_vm4, %v1736_v44, %v1090_v16 }
 0x264   : > { %v1898_v60 = vsel %vm1873_vm8, %v1865_v52, %v1596_v61  ;;  %v1598_v63 = vpop.permute.xlu0 %1597 }
 0x265   : > { %2698 = vmatprep.mubr.msk.f32.mxu1 %vm1922_vm9, %v1898_v60  ;;  %v1899_v11 = vsel %vm1873_vm8, %v1866_v31, %v1598_v63 }
 0x266   : > { %2699 = vmatmul.mubr.msk.f32.gmra.mrb[8].mxu1 %vm1922_vm9, %v1899_v11 }
 0x267   : > { %v1216_v27 = vpop.permute.xlu1 %1215 }
 0x268   : > { %v1344_v34 = vpop.permute.xlu0 %1343  ;;  %v1801_v4 = vsel %vm1774_vm5, %v1768_v28, %v1216_v27 }
 0x269   : > { %v1834_v50 = vsel %vm1807_vm7, %v1801_v4, %v1344_v34 }
 0x26b   : > { %v1218_v17 = vpop.permute.xlu1 %1217 }
 0x26c   : > { %v2673_v7 = vpop.f32.mrb[6].mxu0  ;;  %v1346_v6 = vpop.permute.xlu0 %1345  ;;  %v1802_v45 = vsel %vm1774_vm5, %v1769_v15, %v1218_v17  ;;  %v358_v17 = vld [vmem:[#allocation2 + $0x150] sm:$0xff] }
 0x26d   : > { %v2121_v12 = vadd.f32 %v2673_v7, %v4017_v25  ;;  %v2115_v5 = vpop.f32.mrb[7].mxu0  ;;  %v1835_v19 = vsel %vm1807_vm7, %v1802_v45, %v1346_v6 }
 0x26e   : > { %v2116_v21 = vadd.f32 %v4017_v25, %v2115_v5  ;;  %v359_v5 = vld [vmem:[#allocation2 + $0x158] sm:$0xff] }
 0x26f   : > { %2424 = vst.msk [vmem:[%s4029_s7 + $0x38] sm:$0xff] %vm209_vm0, %v2121_v12  ;;  %v4133_v59 = vpop.permute.xlu1 %963  ;;  %v2322_v13 = vmul.f32 %v2121_v12, %v2121_v12  ;;  %v2257_v10 = vsel %vm209_vm0, %v2121_v12, 0.0 }
 0x270   : > { %v2255_v22 = vsel %vm209_vm0, %v2116_v21, 0.0  ;;  %v2321_v49 = vmul.f32 %v2116_v21, %v2116_v21  ;;  %2423 = vst.msk [vmem:[%s4029_s7 + $0x30] sm:$0xff] %vm209_vm0, %v2116_v21  ;;  %v4138_v30 = vpop.permute.xlu0 %965  ;;  %v4475_v21 = vld [vmem:[#allocation25_spill] sm:$0xff] }
 0x271   : > { %v2256_v43 = vadd.f32 %v2255_v22, %v2254_v48  ;;  %v2360_v2 = vsel %vm209_vm0, %v2322_v13, 0.0  ;;  %v1671_v23 = vsel %vm209_vm0, %v358_v17, %v4475_v21  ;;  %v4476_v22 = vld [vmem:[#allocation45_spill] sm:$0xff] }
 0x272   : > { %v2358_v26 = vsel %vm209_vm0, %v2321_v49, 0.0  ;;  %v1704_v49 = vsel %vm1675_vm2, %v1671_v23, %v4476_v22 }
 0x273   : > { %v2359_v36 = vadd.f32 %v2358_v26, %v2357_v62  ;;  %v1472_v3 = vpop.permute.xlu1 %1471  ;;  %v2258_v39 = vadd.f32 %v2257_v10, %v2256_v43  ;;  %v4477_v43 = vld [vmem:[#allocation28_spill] sm:$0xff]  ;;  %v1737_v10 = vsel %vm1708_vm3, %v1704_v49, %v4133_v59 }
 0x274   : > { %v1474_v57 = vpop.permute.xlu0 %1473  ;;  %v1867_v18 = vsel %vm1840_vm6, %v1834_v50, %v1472_v3  ;;  %v1672_v58 = vsel %vm209_vm0, %v359_v5, %v4477_v43 }
 0x275   : > { %v2361_v20 = vadd.f32 %v2360_v2, %v2359_v36  ;;  %v1868_v54 = vsel %vm1840_vm6, %v1835_v19, %v1474_v57  ;;  %v1705_v47 = vsel %vm1675_vm2, %v1672_v58, %v4478_v32 }
 0x276   : > { %v1738_v3 = vsel %vm1708_vm3, %v1705_v47, %v4138_v30 }
 0x277   : > { %v1092_v9 = vpop.permute.xlu1 %1091 }
 0x278   : > { %v1094_v24 = vpop.permute.xlu0 %1093  ;;  %v1770_v36 = vsel %vm1741_vm4, %v1737_v10, %v1092_v9  ;;  %v360_v9 = vld [vmem:[#allocation2 + $0x168] sm:$0xff] }
 0x279   : > { %v1771_v41 = vsel %vm1741_vm4, %v1738_v3, %v1094_v24 }
 0x27b   : > { %v1600_v14 = vpop.permute.xlu1 %1599 }
 0x27c   : > { %v1900_v38 = vsel %vm1873_vm8, %v1867_v18, %v1600_v14  ;;  %v1602_v42 = vpop.permute.xlu0 %1601 }
 0x27d   : > { %2701 = vmatprep.mubr.msk.f32.mxu1 %vm1922_vm9, %v1900_v38  ;;  %v1901_v40 = vsel %vm1873_vm8, %v1868_v54, %v1602_v42  ;;  %v4479_v54 = vld [vmem:[#allocation27_spill] sm:$0xff] }
 0x27e   : > { %2702 = vmatmul.mubr.msk.f32.gmra.mrb[10].mxu1 %vm1922_vm9, %v1901_v40  ;;  %v1673_v42 = vsel %vm209_vm0, %v360_v9, %v4479_v54 }
 0x27f   : > { %v1220_v29 = vpop.permute.xlu1 %1219 }
 0x280   : > { %v2676_v48 = vpop.f32.mrb[8].mxu0  ;;  %v1348_v53 = vpop.permute.xlu0 %1347 }
 0x281   : > { %v2131_v46 = vadd.f32 %v2676_v48, %v4017_v25  ;;  %v2125_v37 = vpop.f32.mrb[9].mxu0 }
 0x282   : > { %v2126_v16 = vadd.f32 %v4017_v25, %v2125_v37 }
 0x283   : > { %2426 = vst.msk [vmem:[%s4029_s7 + $0x48] sm:$0xff] %vm209_vm0, %v2131_v46  ;;  %v1222_v62 = vpop.permute.xlu1 %1221  ;;  %v2324_v56 = vmul.f32 %v2131_v46, %v2131_v46  ;;  %v2261_v31 = vsel %vm209_vm0, %v2131_v46, 0.0  ;;  %v4480_v46 = vld [vmem:[#allocation47_spill] sm:$0xff] }
 0x284   : > { %v2259_v52 = vsel %vm209_vm0, %v2126_v16, 0.0  ;;  %v2323_v61 = vmul.f32 %v2126_v16, %v2126_v16  ;;  %2425 = vst.msk [vmem:[%s4029_s7 + $0x40] sm:$0xff] %vm209_vm0, %v2126_v16  ;;  %v1350_v60 = vpop.permute.xlu0 %1349  ;;  %v1804_v2 = vsel %vm1774_vm5, %v1771_v41, %v1222_v62 }
 0x285   : > { %v2260_v35 = vadd.f32 %v2259_v52, %v2258_v39  ;;  %v2364_v7 = vsel %vm209_vm0, %v2324_v56, 0.0  ;;  %v1803_v39 = vsel %vm1774_vm5, %v1770_v36, %v1220_v29  ;;  %v1837_v30 = vsel %vm1807_vm7, %v1804_v2, %v1350_v60  ;;  %v361_v60 = vld [vmem:[#allocation2 + $0x170] sm:$0xff] }
 0x286   : > { %v2362_v63 = vsel %vm209_vm0, %v2323_v61, 0.0  ;;  %v1836_v59 = vsel %vm1807_vm7, %v1803_v39, %v1348_v53  ;;  %v1706_v53 = vsel %vm1675_vm2, %v1673_v42, %v4480_v46 }
 0x287   : > { %v2363_v11 = vadd.f32 %v2362_v63, %v2361_v20  ;;  %v968_v27 = vpop.permute.xlu1 %967  ;;  %v2262_v34 = vadd.f32 %v2261_v31, %v2260_v35 }
 0x288   : > { %v970_v12 = vpop.permute.xlu0 %969  ;;  %v1739_v16 = vsel %vm1708_vm3, %v1706_v53, %v968_v27 }
 0x289   : > { %v2365_v6 = vadd.f32 %v2364_v7, %v2363_v11  ;;  %v4481_v11 = vld [vmem:[#allocation29_spill] sm:$0xff] }
 0x28b   : > { %v1476_v13 = vpop.permute.xlu1 %1475 }
 0x28c   : > { %v1478_v26 = vpop.permute.xlu0 %1477  ;;  %v1869_v1 = vsel %vm1840_vm6, %v1836_v59, %v1476_v13 }
 0x28d   : > { %v1870_v44 = vsel %vm1840_vm6, %v1837_v30, %v1478_v26 }
 0x28f   : > { %v1096_v51 = vpop.permute.xlu1 %1095 }
 0x290   : > { %v1098_v8 = vpop.permute.xlu0 %1097  ;;  %v1772_v52 = vsel %vm1741_vm4, %v1739_v16, %v1096_v51 }
 0x291   : > { %v2679_v0 = vpop.f32.mrb[10].mxu0 }
 0x292   : > { %v2141_v57 = vadd.f32 %v2679_v0, %v4017_v25  ;;  %v2135_v55 = vpop.f32.mrb[11].mxu0 }
 0x293   : > { %v1604_v20 = vpop.permute.xlu1 %1603  ;;  %v2136_v28 = vadd.f32 %v4017_v25, %v2135_v55 }
 0x294   : > { %v1902_v33 = vsel %vm1873_vm8, %v1869_v1, %v1604_v20  ;;  %2428 = vst.msk [vmem:[%s4029_s7 + $0x58] sm:$0xff] %vm209_vm0, %v2141_v57  ;;  %v1606_v4 = vpop.permute.xlu0 %1605  ;;  %v2326_v15 = vmul.f32 %v2141_v57, %v2141_v57  ;;  %v2265_v19 = vsel %vm209_vm0, %v2141_v57, 0.0 }
 0x295   : > { %2704 = vmatprep.mubr.msk.f32.mxu1 %vm1922_vm9, %v1902_v33  ;;  %v2263_v45 = vsel %vm209_vm0, %v2136_v28, 0.0  ;;  %v2325_v24 = vmul.f32 %v2136_v28, %v2136_v28  ;;  %2427 = vst.msk [vmem:[%s4029_s7 + $0x50] sm:$0xff] %vm209_vm0, %v2136_v28  ;;  %v1903_v50 = vsel %vm1873_vm8, %v1870_v44, %v1606_v4 }
 0x296   : > { %v2264_v18 = vadd.f32 %v2263_v45, %v2262_v34  ;;  %2705 = vmatmul.mubr.msk.f32.gmra.mrb[12].mxu1 %vm1922_vm9, %v1903_v50  ;;  %v2368_v37 = vsel %vm209_vm0, %v2326_v15, 0.0  ;;  %v1674_v34 = vsel %vm209_vm0, %v361_v60, %v4481_v11 }
 0x297   : > { %v1224_v14 = vpop.permute.xlu1 %1223  ;;  %v2366_v38 = vsel %vm209_vm0, %v2325_v24, 0.0 }
 0x298   : > { %v2367_v40 = vadd.f32 %v2366_v38, %v2365_v6  ;;  %v1352_v29 = vpop.permute.xlu0 %1351  ;;  %v2266_v48 = vadd.f32 %v2265_v19, %v2264_v18  ;;  %v1805_v61 = vsel %vm1774_vm5, %v1772_v52, %v1224_v14  ;;  %v4482_v6 = vld [vmem:[#allocation49_spill] sm:$0xff] }
 0x299   : > { %v1838_v63 = vsel %vm1807_vm7, %v1805_v61, %v1352_v29  ;;  %v1707_v27 = vsel %vm1675_vm2, %v1674_v34, %v4482_v6 }
 0x29a   : > { %v2369_v56 = vadd.f32 %v2368_v37, %v2367_v40  ;;  %v1740_v21 = vsel %vm1708_vm3, %v1707_v27, %v970_v12 }
 0x29b   : > { %v1226_v62 = vpop.permute.xlu1 %1225  ;;  %v1773_v13 = vsel %vm1741_vm4, %v1740_v21, %v1098_v8 }
 0x29c   : > { %v1480_v35 = vpop.permute.xlu0 %1479  ;;  %v1806_v22 = vsel %vm1774_vm5, %v1773_v13, %v1226_v62 }
 0x29d   : > { %v1871_v17 = vsel %vm1840_vm6, %v1838_v63, %v1480_v35 }
 0x29f   : > { %v1354_v31 = vpop.permute.xlu1 %1353 }
 0x2a0   : > { %v1608_v7 = vpop.permute.xlu0 %1607  ;;  %v1839_v49 = vsel %vm1807_vm7, %v1806_v22, %v1354_v31 }
 0x2a1   : > { %v1904_v5 = vsel %vm1873_vm8, %v1871_v17, %v1608_v7 }
 0x2a2   : > { %2707 = vmatprep.mubr.msk.f32.mxu1 %vm1922_vm9, %v1904_v5 }
 0x2a3   : > { %v1482_v23 = vpop.permute.xlu1 %1481 }
 0x2a4   : > { %v1872_v43 = vsel %vm1840_vm6, %v1839_v49, %v1482_v23 }
 0x2a7   : > { %v1610_v58 = vpop.permute.xlu1 %1609 }
 0x2a8   : > { %v1905_v10 = vsel %vm1873_vm8, %v1872_v43, %v1610_v58 }
 0x2a9   : > { %2708 = vmatmul.mubr.msk.f32.gmra.mrb[14].mxu1 %vm1922_vm9, %v1905_v10  ;;  %v2682_v26 = vpop.f32.mrb[12].mxu0 }
 0x2aa   : > { %v2151_v12 = vadd.f32 %v2682_v26, %v4017_v25  ;;  %v2145_v32 = vpop.f32.mrb[13].mxu0 }
 0x2ab   : > { %v2146_v47 = vadd.f32 %v4017_v25, %v2145_v32 }
 0x2ac   : > { %2430 = vst.msk [vmem:[%s4029_s7 + $0x68] sm:$0xff] %vm209_vm0, %v2151_v12  ;;  %v2328_v36 = vmul.f32 %v2151_v12, %v2151_v12  ;;  %v2269_v41 = vsel %vm209_vm0, %v2151_v12, 0.0 }
 0x2ad   : > { %v2267_v3 = vsel %vm209_vm0, %v2146_v47, 0.0  ;;  %v2327_v39 = vmul.f32 %v2146_v47, %v2146_v47  ;;  %2429 = vst.msk [vmem:[%s4029_s7 + $0x60] sm:$0xff] %vm209_vm0, %v2146_v47 }
 0x2ae   : > { %v2268_v51 = vadd.f32 %v2267_v3, %v2266_v48  ;;  %v2372_v0 = vsel %vm209_vm0, %v2328_v36, 0.0 }
 0x2af   : > { %v2370_v2 = vsel %vm209_vm0, %v2327_v39, 0.0 }
 0x2b0   : > { %v2371_v8 = vadd.f32 %v2370_v2, %v2369_v56  ;;  %v2270_v59 = vadd.f32 %v2269_v41, %v2268_v51 }
 0x2b2   : > { %v2373_v1 = vadd.f32 %v2372_v0, %v2371_v8 }
 0x2c1   : > { %v2685_v57 = vpop.f32.mrb[14].mxu0 }
 0x2c2   : > { %v2161_v20 = vadd.f32 %v2685_v57, %v4017_v25  ;;  %v2155_v55 = vpop.f32.mrb[15].mxu0 }
 0x2c3   : > { %v2156_v30 = vadd.f32 %v4017_v25, %v2155_v55 }
 0x2c4   : > { %2432 = vst.msk [vmem:[%s4029_s7 + $0x78] sm:$0xff] %vm209_vm0, %v2161_v20  ;;  %v2330_v33 = vmul.f32 %v2161_v20, %v2161_v20  ;;  %v2273_v9 = vsel %vm209_vm0, %v2161_v20, 0.0 }
 0x2c5   : > { %v2271_v28 = vsel %vm209_vm0, %v2156_v30, 0.0  ;;  %v2329_v44 = vmul.f32 %v2156_v30, %v2156_v30  ;;  %2431 = vst.msk [vmem:[%s4029_s7 + $0x70] sm:$0xff] %vm209_vm0, %v2156_v30 }
 0x2c6   : > { %v2272_v4 = vadd.f32 %v2271_v28, %v2270_v59  ;;  %v2376_v50 = vsel %vm209_vm0, %v2330_v33, 0.0 }
 0x2c7   : > { %v2374_v15 = vsel %vm209_vm0, %v2329_v44, 0.0 }
 0x2c8   : > { %v2375_v45 = vadd.f32 %v2374_v15, %v2373_v1  ;;  %v2274_v24 = vadd.f32 %v2273_v9, %v2272_v4 }
 0x2ca   : > { %v2377_v18 = vadd.f32 %v2376_v50, %v2375_v45 }
 0x2d9   : > { %v2688_v14 = vpop.f32.mrb[0].mxu1 }
 0x2da   : > { %v2171_v19 = vadd.f32 %v2688_v14, %v4017_v25  ;;  %v2165_v38 = vpop.f32.mrb[1].mxu1 }
 0x2db   : > { %v2166_v54 = vadd.f32 %v4017_v25, %v2165_v38 }
 0x2dc   : > { %2434 = vst.msk [vmem:[%s4029_s7 + $0x88] sm:$0xff] %vm209_vm0, %v2171_v19  ;;  %v2332_v42 = vmul.f32 %v2171_v19, %v2171_v19  ;;  %v2277_v46 = vsel %vm209_vm0, %v2171_v19, 0.0 }
 0x2dd   : > { %v2275_v40 = vsel %vm209_vm0, %v2166_v54, 0.0  ;;  %v2331_v29 = vmul.f32 %v2166_v54, %v2166_v54  ;;  %2433 = vst.msk [vmem:[%s4029_s7 + $0x80] sm:$0xff] %vm209_vm0, %v2166_v54 }
 0x2de   : > { %v2276_v48 = vadd.f32 %v2275_v40, %v2274_v24  ;;  %v2380_v62 = vsel %vm209_vm0, %v2332_v42, 0.0 }
 0x2df   : > { %v2378_v53 = vsel %vm209_vm0, %v2331_v29, 0.0 }
 0x2e0   : > { %v2379_v37 = vadd.f32 %v2378_v53, %v2377_v18  ;;  %v2278_v16 = vadd.f32 %v2277_v46, %v2276_v48 }
 0x2e2   : > { %v2381_v56 = vadd.f32 %v2380_v62, %v2379_v37 }
 0x2f1   : > { %v2691_v52 = vpop.f32.mrb[2].mxu1 }
 0x2f2   : > { %v2181_v61 = vadd.f32 %v2691_v52, %v4017_v25  ;;  %v2175_v35 = vpop.f32.mrb[3].mxu1 }
 0x2f3   : > { %v2176_v60 = vadd.f32 %v4017_v25, %v2175_v35 }
 0x2f4   : > { %2436 = vst.msk [vmem:[%s4029_s7 + $0x98] sm:$0xff] %vm209_vm0, %v2181_v61  ;;  %v2334_v31 = vmul.f32 %v2181_v61, %v2181_v61  ;;  %v2281_v17 = vsel %vm209_vm0, %v2181_v61, 0.0 }
 0x2f5   : > { %v2279_v63 = vsel %vm209_vm0, %v2176_v60, 0.0  ;;  %v2333_v11 = vmul.f32 %v2176_v60, %v2176_v60  ;;  %2435 = vst.msk [vmem:[%s4029_s7 + $0x90] sm:$0xff] %vm209_vm0, %v2176_v60 }
 0x2f6   : > { %v2280_v34 = vadd.f32 %v2279_v63, %v2278_v16  ;;  %v2384_v5 = vsel %vm209_vm0, %v2334_v31, 0.0 }
 0x2f7   : > { %v2382_v7 = vsel %vm209_vm0, %v2333_v11, 0.0 }
 0x2f8   : > { %v2383_v6 = vadd.f32 %v2382_v7, %v2381_v56  ;;  %v2282_v27 = vadd.f32 %v2281_v17, %v2280_v34 }
 0x2fa   : > { %v2385_v21 = vadd.f32 %v2384_v5, %v2383_v6 }
 0x309   : > { %v2694_v23 = vpop.f32.mrb[4].mxu1 }
 0x30a   : > { %v2191_v13 = vadd.f32 %v2694_v23, %v4017_v25  ;;  %v2185_v22 = vpop.f32.mrb[5].mxu1 }
 0x30b   : > { %v2186_v49 = vadd.f32 %v4017_v25, %v2185_v22 }
 0x30c   : > { %2438 = vst.msk [vmem:[%s4029_s7 + $0xa8] sm:$0xff] %vm209_vm0, %v2191_v13  ;;  %v2336_v43 = vmul.f32 %v2191_v13, %v2191_v13  ;;  %v2285_v12 = vsel %vm209_vm0, %v2191_v13, 0.0 }
 0x30d   : > { %v2283_v58 = vsel %vm209_vm0, %v2186_v49, 0.0  ;;  %v2335_v10 = vmul.f32 %v2186_v49, %v2186_v49  ;;  %2437 = vst.msk [vmem:[%s4029_s7 + $0xa0] sm:$0xff] %vm209_vm0, %v2186_v49 }
 0x30e   : > { %v2284_v26 = vadd.f32 %v2283_v58, %v2282_v27  ;;  %v2388_v3 = vsel %vm209_vm0, %v2336_v43, 0.0 }
 0x30f   : > { %v2386_v32 = vsel %vm209_vm0, %v2335_v10, 0.0 }
 0x310   : > { %v2387_v47 = vadd.f32 %v2386_v32, %v2385_v21  ;;  %v2286_v36 = vadd.f32 %v2285_v12, %v2284_v26 }
 0x312   : > { %v2389_v39 = vadd.f32 %v2388_v3, %v2387_v47 }
 0x321   : > { %v2697_v51 = vpop.f32.mrb[6].mxu1 }
 0x322   : > { %v2201_v41 = vadd.f32 %v2697_v51, %v4017_v25  ;;  %v2195_v2 = vpop.f32.mrb[7].mxu1 }
 0x323   : > { %v2196_v8 = vadd.f32 %v4017_v25, %v2195_v2 }
 0x324   : > { %2440 = vst.msk [vmem:[%s4029_s7 + $0xb8] sm:$0xff] %vm209_vm0, %v2201_v41  ;;  %v2338_v59 = vmul.f32 %v2201_v41, %v2201_v41  ;;  %v2289_v20 = vsel %vm209_vm0, %v2201_v41, 0.0 }
 0x325   : > { %v2287_v0 = vsel %vm209_vm0, %v2196_v8, 0.0  ;;  %v2337_v1 = vmul.f32 %v2196_v8, %v2196_v8  ;;  %2439 = vst.msk [vmem:[%s4029_s7 + $0xb0] sm:$0xff] %vm209_vm0, %v2196_v8 }
 0x326   : > { %v2288_v57 = vadd.f32 %v2287_v0, %v2286_v36  ;;  %v2392_v28 = vsel %vm209_vm0, %v2338_v59, 0.0 }
 0x327   : > { %v2390_v55 = vsel %vm209_vm0, %v2337_v1, 0.0 }
 0x328   : > { %v2391_v30 = vadd.f32 %v2390_v55, %v2389_v39  ;;  %v2290_v33 = vadd.f32 %v2289_v20, %v2288_v57 }
 0x32a   : > { %v2393_v44 = vadd.f32 %v2392_v28, %v2391_v30 }
 0x339   : > { %v2700_v4 = vpop.f32.mrb[8].mxu1 }
 0x33a   : > { %v2211_v9 = vadd.f32 %v2700_v4, %v4017_v25  ;;  %v2205_v15 = vpop.f32.mrb[9].mxu1 }
 0x33b   : > { %v2206_v45 = vadd.f32 %v4017_v25, %v2205_v15 }
 0x33c   : > { %2442 = vst.msk [vmem:[%s4029_s7 + $0xc8] sm:$0xff] %vm209_vm0, %v2211_v9  ;;  %v2340_v24 = vmul.f32 %v2211_v9, %v2211_v9  ;;  %v2293_v19 = vsel %vm209_vm0, %v2211_v9, 0.0 }
 0x33d   : > { %v2291_v50 = vsel %vm209_vm0, %v2206_v45, 0.0  ;;  %v2339_v18 = vmul.f32 %v2206_v45, %v2206_v45  ;;  %2441 = vst.msk [vmem:[%s4029_s7 + $0xc0] sm:$0xff] %vm209_vm0, %v2206_v45 }
 0x33e   : > { %v2292_v14 = vadd.f32 %v2291_v50, %v2290_v33  ;;  %v2396_v40 = vsel %vm209_vm0, %v2340_v24, 0.0 }
 0x33f   : > { %v2394_v38 = vsel %vm209_vm0, %v2339_v18, 0.0 }
 0x340   : > { %v2395_v54 = vadd.f32 %v2394_v38, %v2393_v44  ;;  %v2294_v42 = vadd.f32 %v2293_v19, %v2292_v14 }
 0x342   : > { %v2397_v29 = vadd.f32 %v2396_v40, %v2395_v54 }
 0x351   : > { %v2703_v48 = vpop.f32.mrb[10].mxu1 }
 0x352   : > { %v2221_v46 = vadd.f32 %v2703_v48, %v4017_v25  ;;  %v2215_v53 = vpop.f32.mrb[11].mxu1 }
 0x353   : > { %v2216_v37 = vadd.f32 %v4017_v25, %v2215_v53 }
 0x354   : > { %2444 = vst.msk [vmem:[%s4029_s7 + $0xd8] sm:$0xff] %vm209_vm0, %v2221_v46  ;;  %v2342_v16 = vmul.f32 %v2221_v46, %v2221_v46  ;;  %v2297_v61 = vsel %vm209_vm0, %v2221_v46, 0.0 }
 0x355   : > { %v2295_v62 = vsel %vm209_vm0, %v2216_v37, 0.0  ;;  %v2341_v56 = vmul.f32 %v2216_v37, %v2216_v37  ;;  %2443 = vst.msk [vmem:[%s4029_s7 + $0xd0] sm:$0xff] %vm209_vm0, %v2216_v37 }
 0x356   : > { %v2296_v52 = vadd.f32 %v2295_v62, %v2294_v42  ;;  %v2400_v63 = vsel %vm209_vm0, %v2342_v16, 0.0 }
 0x357   : > { %v2398_v35 = vsel %vm209_vm0, %v2341_v56, 0.0 }
 0x358   : > { %v2399_v60 = vadd.f32 %v2398_v35, %v2397_v29  ;;  %v2298_v31 = vadd.f32 %v2297_v61, %v2296_v52 }
 0x35a   : > { %v2401_v11 = vadd.f32 %v2400_v63, %v2399_v60 }
 0x369   : > { %v2706_v34 = vpop.f32.mrb[12].mxu1 }
 0x36a   : > { %v2231_v17 = vadd.f32 %v2706_v34, %v4017_v25  ;;  %v2225_v7 = vpop.f32.mrb[13].mxu1 }
 0x36b   : > { %v2226_v6 = vadd.f32 %v4017_v25, %v2225_v7 }
 0x36c   : > { %2446 = vst.msk [vmem:[%s4029_s7 + $0xe8] sm:$0xff] %vm209_vm0, %v2231_v17  ;;  %v2344_v27 = vmul.f32 %v2231_v17, %v2231_v17  ;;  %v2301_v13 = vsel %vm209_vm0, %v2231_v17, 0.0 }
 0x36d   : > { %v2299_v5 = vsel %vm209_vm0, %v2226_v6, 0.0  ;;  %v2343_v21 = vmul.f32 %v2226_v6, %v2226_v6  ;;  %2445 = vst.msk [vmem:[%s4029_s7 + $0xe0] sm:$0xff] %vm209_vm0, %v2226_v6 }
 0x36e   : > { %v2300_v23 = vadd.f32 %v2299_v5, %v2298_v31  ;;  %v2404_v58 = vsel %vm209_vm0, %v2344_v27, 0.0 }
 0x36f   : > { %v2402_v22 = vsel %vm209_vm0, %v2343_v21, 0.0 }
 0x370   : > { %v2403_v49 = vadd.f32 %v2402_v22, %v2401_v11  ;;  %v2302_v43 = vadd.f32 %v2301_v13, %v2300_v23 }
 0x372   : > { %v2405_v10 = vadd.f32 %v2404_v58, %v2403_v49 }
 0x37c   : > { %v2709_v26 = vpop.f32.mrb[14].mxu1 }
 0x37d   : > { %v2241_v12 = vadd.f32 %v2709_v26, %v4017_v25  ;;  %v2235_v32 = vpop.f32.mrb[15].mxu1 }
 0x37e   : > { %v2236_v47 = vadd.f32 %v4017_v25, %v2235_v32 }
 0x37f   : > { %2448 = vst.msk [vmem:[%s4029_s7 + $0xf8] sm:$0xff] %vm209_vm0, %v2241_v12  ;;  %v2346_v36 = vmul.f32 %v2241_v12, %v2241_v12  ;;  %v2305_v41 = vsel %vm209_vm0, %v2241_v12, 0.0 }
 0x380   : > { %v2303_v3 = vsel %vm209_vm0, %v2236_v47, 0.0  ;;  %v2345_v39 = vmul.f32 %v2236_v47, %v2236_v47  ;;  %2447 = vst.msk [vmem:[%s4029_s7 + $0xf0] sm:$0xff] %vm209_vm0, %v2236_v47 }
 0x381   : > { %v2304_v51 = vadd.f32 %v2303_v3, %v2302_v43  ;;  %v2408_v0 = vsel %vm209_vm0, %v2346_v36, 0.0 }
 0x382   : > { %v2406_v2 = vsel %vm209_vm0, %v2345_v39, 0.0 }
 0x383   : > { %v2306_v8 = vadd.f32 %v2305_v41, %v2304_v51  ;;  %v2407_v59 = vadd.f32 %v2406_v2, %v2405_v10 }
 0x385   : > { %v2307_v1 = vrot.slane %v2306_v8, 4  ;;  %v2409_v25 = vadd.f32 %v2408_v0, %v2407_v59 }
 0x387   : > { %v2308_v57 = vadd.f32 %v2307_v1, %v2306_v8  ;;  %v2410_v20 = vrot.slane %v2409_v25, 4 }
 0x389   : > { %v2309_v55 = vrot.slane %v2308_v57, 2  ;;  %v2411_v30 = vadd.f32 %v2410_v20, %v2409_v25 }
 0x38b   : > { %v2310_v33 = vadd.f32 %v2309_v55, %v2308_v57  ;;  %v2412_v28 = vrot.slane %v2411_v30, 2 }
 0x38d   : > { %v2311_v44 = vrot.slane %v2310_v33, 1  ;;  %v2413_v4 = vadd.f32 %v2412_v28, %v2411_v30 }
 0x38f   : > { %v2312_v9 = vadd.f32 %v2311_v44, %v2310_v33  ;;  %v2414_v15 = vrot.slane %v2413_v4, 1 }
 0x391   : > { %2314 = vst.msk [vmem:[%s198_s10] sm:$0x1] %vm2313_vm10, %v2312_v9  ;;  %v2415_v45 = vadd.f32 %v2414_v15, %v2413_v4 }
 0x393   : > { %2416 = vst.msk [vmem:[%s198_s10 + $0x1] sm:$0x1] %vm2313_vm10, %v2415_v45 }
 0x394   : > { %2797 = shalt.err (!%p2794_p3)
}
 0x395   : > { %s2798_s5 = scalar_lea.hbm %s4338_s14, 32  ;;  %s2802_s6 = scalar_lea.hbm %s4384_s4, 64 }
 0x396   : > { %p2799_p4 = scmp.ne.s32.totalorder %s4338_s14, %s2798_s5  ;;  %p2803_p9 = scmp.lt.u32.totalorder %s4338_s14, %s4384_s4 }
 0x397   : > { %p2804_p10 = scmp.lt.u32.totalorder %s2802_s6, %s2798_s5  ;;  %p2806_p12 = scmp.lt.u32.totalorder %s2798_s5, %s4338_s14 }
 0x398   : > { %p2800_p7 = pnand %p2799_p4, %p2921_p5 }
 0x399   : > { %p2805_p11 = por %p2804_p10, %p2803_p9 }
 0x39a   : > { %p2801_p8 = pneg %p2800_p7 }
 0x39b   : > { %p2807_p13 = por %p2806_p12, %p2805_p11 }
 0x39d   : > { %p2808_p0 = pnand %p2807_p13, %p2801_p8 }
 0x39f   : > { %2811 = shalt.err (!%p2808_p0)
}
 0x3a0   : > { %2736 = dma.vmem_to_hbm [thread:$0]  (%p2921_p5), %s4340_s11, 32, %s4338_s14, %s2455_s20  }
 0x3a1 PF: > { %p2742_p1 = scmp.ge.s32.totalorder %s2846_s18, 2  ;;  %s2491_s28 = sand.u32 1, %s2834_s15  }
 0x3a2   : > { %s2492_s9 = scalar_lea.sflag [#allocation4], %s2491_s28 }
 0x3a3   : > { %p2739_p2 = pnand %p2742_p1, %p2925_p6 }
 0x3a5   : > { %2829 = dma.done.wait (!%p2739_p2), %s2492_s9, 32  }
 0x3a6   : > { %2831 = vsyncadd (!%p2739_p2), %s2492_s9, 4294967264  ;;  %p15_p3 = scmp.ge.s32.totalorder %s2908_s21, 4   ;;  %s4483_s15 = smov %s2838_s16 }
 0x3a7   : > { %s4484_s16 = smov %s2842_s17  ;;  %s4485_s17 = smov %s2919_s24 }
 0x3a8   : > { %s4486_s18 = smov %s2908_s21  ;;  %17 = sbr.rel (!%p15_p3) target bundleno = 3 (0x3), region = 81 }
 0x3af   :  { %2497 = vsyncpa [#allocation4], 1 }
 0x3b0   :  { %2499 = vsyncpa [#allocation4 + $0x1], 1 }

</bundles_post_ra>
